<compile_context>
chip_gen: v5e
topology: v5e:2x2
jax: 0.10.0
libtpu: 0.0.40
codegen_flags: <defaults>
</compile_context>

<pallas_src>
import math
from functools import partial

import numpy as np
import jax
import jax.numpy as jnp
from jax.experimental import pallas as pl
from jax.experimental.pallas import tpu as pltpu


def _round_up(x, m):
    return ((x + m - 1) // m) * m


def _pick_tk(kp):
    for t in (512, 256, 128):
        if kp % t == 0:
            return t
    return kp


def _pick_tn(npd):
    # TODO(synk): on v5e a 128-wide N tile always matches the 4x128x128 MXU;
    # generation-specific tile picks could be added here.
    return 256 if npd % 256 == 0 else 128


# ----------------------------------------------------------------------------
# Generation-aware VMEM budgeting
# ----------------------------------------------------------------------------
_VMEM_CAP = [None]


def _vmem_capacity_bytes():
    if _VMEM_CAP[0] is None:
        try:
            _VMEM_CAP[0] = int(pltpu.get_tpu_info().vmem_capacity_bytes)
        except Exception:
            _VMEM_CAP[0] = 64 * (1 << 20)        # conservative (v7x per-core)
    return _VMEM_CAP[0]


def _vmem_limit_bytes():
    # Explicit scoped-VMEM limit for every pallas_call.
    return int(min(0.85 * _vmem_capacity_bytes(), 100 * (1 << 20)))


def _compiler_params(dimension_semantics):
    return pltpu.CompilerParams(dimension_semantics=dimension_semantics,
                                vmem_limit_bytes=_vmem_limit_bytes())


# ----------------------------------------------------------------------------
# Pallas kernels
# ----------------------------------------------------------------------------
def _gemm_kernel_nok(x_ref, w_ref, b_ref, o_ref, *, relu):
    # Single K step: one dot, bias + ReLU fused in the epilogue.
    acc = jnp.dot(x_ref[...], w_ref[...], preferred_element_type=jnp.float32)
    acc = acc + b_ref[...].astype(jnp.float32)
    if relu:
        acc = jnp.maximum(acc, 0.0)
    o_ref[...] = acc.astype(o_ref.dtype)


def _gemm_kernel_acc(x_ref, w_ref, b_ref, o_ref, acc_ref, *, relu):
    # Multi-step K reduction; bias folded into the accumulator init.
    k = pl.program_id(2)

    @pl.when(k == 0)
    def _init():
        acc_ref[...] = jnp.broadcast_to(b_ref[...].astype(jnp.float32),
                                        acc_ref.shape)

    acc_ref[...] += jnp.dot(x_ref[...], w_ref[...],
                            preferred_element_type=jnp.float32)

    @pl.when(k == pl.num_programs(2) - 1)
    def _fin():
        out = acc_ref[...]
        if relu:
            out = jnp.maximum(out, 0.0)
        o_ref[...] = out.astype(o_ref.dtype)


def _conv3x3_kernel(x_ref, w_ref, b_ref, o_ref, acc_ref, *, H, W, relu):
    # x_ref:   (1, H+2, Wpp, tk)  spatially padded bf16 activations
    # w_ref:   (3, tk, 3*tn)      bf16 fused-dx weights
    #                             (w_ref[dy][:, dx*tn:(dx+1)*tn] = W[dy, dx])
    # b_ref:   (1, tn)            f32 bias (BN beta folded)
    # o_ref:   (1, H, W, tn)      bf16 output block
    # acc_ref: (H*Wpp, tn)        ONE f32 accumulator (dx taps pre-rolled)
    k = pl.program_id(2)

    @pl.when(k == 0)
    def _init():
        acc_ref[...] = jnp.zeros_like(acc_ref)

    rows_total, tn = acc_ref.shape
    wpp = rows_total // H
    tk = x_ref.shape[-1]
    for dy in range(3):
        rows = x_ref[0, dy:dy + H].reshape(rows_total, tk)      # (H*Wpp, tk)
        # One wide MXU dot per dy: N = 3*tn (the 3 dx taps fused in columns).
        p = jnp.dot(rows, w_ref[dy], preferred_element_type=jnp.float32)
        contrib = p[:, 0:tn]
        for dx in (1, 2):
            # Pre-shift the dx tap along W (sublane roll, XLU slot) so a
            # single accumulator suffices; wrapped-around values only land in
            # the padded columns w >= W and are discarded in the epilogue.
            contrib = contrib + pltpu.roll(p[:, dx * tn:(dx + 1) * tn],
                                           shift=rows_total - dx, axis=0)
        acc_ref[...] += contrib

    @pl.when(k == pl.num_programs(2) - 1)
    def _fin():
        out = (acc_ref[...].reshape(H, wpp, tn)[:, 0:W, :]
               + b_ref[...].astype(jnp.float32).reshape(1, 1, -1))
        if relu:
            out = jnp.maximum(out, 0.0)
        o_ref[...] = out[jnp.newaxis].astype(o_ref.dtype)


# ----------------------------------------------------------------------------
# Conv wrappers
# ----------------------------------------------------------------------------
def gemm_bias_act(x2d, w_p, b_p, relu, out_dtype=jnp.bfloat16):
    """x2d: (M, K); w_p: (Kp, Np) bf16 pre-padded; b_p: (1, Np) f32.

    Returns (M, Np) out_dtype; output channels stay lane-padded."""
    M, K = x2d.shape
    Kp, Np = w_p.shape

    if M < 128:
        # Tiny GEMMs (PPM branches, M = N*scale^2): the MXU would run nearly
        # empty and per-call Pallas dispatch dominates - let XLA handle them.
        acc = jnp.dot(x2d.astype(jnp.bfloat16), w_p[:K],
                      preferred_element_type=jnp.float32) + b_p
        if relu:
            acc = jnp.maximum(acc, 0.0)
        return acc.astype(out_dtype)

    if M <= 1024:
        tm = Mp = _round_up(M, 8)
    else:
        tm = 512 if M % 512 == 0 else 256
        Mp = _round_up(M, tm)
    tn = _pick_tn(Np)
    tk = _pick_tk(Kp)
    nk = Kp // tk

    xp = x2d
    if Mp != M or Kp != K:
        xp = jnp.pad(x2d, ((0, Mp - M), (0, Kp - K)))
    xp = xp.astype(jnp.bfloat16)

    if nk == 1:
        out = pl.pallas_call(
            partial(_gemm_kernel_nok, relu=relu),
            out_shape=jax.ShapeDtypeStruct((Mp, Np), out_dtype),
            grid_spec=pltpu.PrefetchScalarGridSpec(
                num_scalar_prefetch=0,
                grid=(Mp // tm, Np // tn),
                in_specs=[pl.BlockSpec((tm, Kp), lambda i, j: (i, 0)),
                          pl.BlockSpec((Kp, tn), lambda i, j: (0, j)),
                          pl.BlockSpec((1, tn), lambda i, j: (0, j))],
                out_specs=pl.BlockSpec((tm, tn), lambda i, j: (i, j))),
            compiler_params=_compiler_params(("parallel", "parallel")),
        )(xp, w_p, b_p)
    else:
        out = pl.pallas_call(
            partial(_gemm_kernel_acc, relu=relu),
            out_shape=jax.ShapeDtypeStruct((Mp, Np), out_dtype),
            grid_spec=pltpu.PrefetchScalarGridSpec(
                num_scalar_prefetch=0,
                grid=(Mp // tm, Np // tn, nk),
                in_specs=[pl.BlockSpec((tm, tk), lambda i, j, k: (i, k)),
                          pl.BlockSpec((tk, tn), lambda i, j, k: (k, j)),
                          pl.BlockSpec((1, tn), lambda i, j, k: (0, j))],
                out_specs=pl.BlockSpec((tm, tn), lambda i, j, k: (i, j)),
                scratch_shapes=[pltpu.VMEM((tm, tn), jnp.float32)]),
            compiler_params=_compiler_params(
                ("parallel", "parallel", "arbitrary")),
        )(xp, w_p, b_p)
    if Mp != M:
        out = out[:M]
    return out


def conv1x1(x, w_p, b_p, relu, out_dtype=jnp.bfloat16):
    """x: (N,H,W,Cin); w_p pre-padded (Kp,Np) bf16; b_p (1,Np) f32.

    Returns (N,H,W,Np) - channels stay lane-padded."""
    Nb, H, W, C = x.shape
    Np = w_p.shape[1]
    out = gemm_bias_act(x.reshape(Nb * H * W, C), w_p, b_p, relu, out_dtype)
    return out.reshape(Nb, H, W, Np)


def _unfuse_w3(w_f):
    """(3, Kp, 3*Np) fused-dx layout -> canonical (3, 3, Kp, Np)."""
    _, kp, n3 = w_f.shape
    npd = n3 // 3
    tn = _pick_tn(npd)
    w5 = w_f.reshape(3, kp, npd // tn, 3, tn)
    return jnp.transpose(w5, (0, 3, 1, 2, 4)).reshape(3, 3, kp, npd)


def _conv3x3_im2col(x, w_f, b_p, relu):
    # Safety-net path (never hit at the test shapes).
    Nb, H, W, C = x.shape
    Kp = w_f.shape[1]
    Np = w_f.shape[2] // 3
    w2 = _unfuse_w3(w_f).reshape(9 * Kp, Np)
    xp = jnp.pad(x.astype(jnp.bfloat16), ((0, 0), (1, 1), (1, 1), (0, Kp - C)))
    patches = jnp.concatenate(
        [xp[:, dy:dy + H, dx:dx + W, :] for dy in range(3) for dx in range(3)],
        axis=-1)
    out = gemm_bias_act(patches.reshape(Nb * H * W, 9 * Kp), w2, b_p, relu)
    return out.reshape(Nb, H, W, Np)


def conv3x3(x, w_f, b_p, relu):
    """Fused 3x3 conv, stride 1, pad 1, + bias + optional ReLU.

    x:   (N,H,W,C) with C <= Kp (extra zero-padded channels are fine).
    w_f: (3, Kp, 3*Np) bf16 fused-dx layout; b_p: (1, Np) f32.
    Returns (N, H, W, Np) bf16 - channels stay lane-padded."""
    Nb, H, W, C = x.shape
    Kp = w_f.shape[1]
    Np = w_f.shape[2] // 3
    tn = _pick_tn(Np)
    tk = _pick_tk(Kp)
    nk = Kp // tk
    Wpp = _round_up(W + 2, 8)               # width padded to sublane multiple

    budget = int(0.7 * _vmem_limit_bytes())

    def est(th):
        xin = 2 * (th + 2) * Wpp * tk * 2        # double-buffered input block
        wgt = 2 * 3 * tk * 3 * tn * 2            # double-buffered weight block
        outb = 2 * th * W * tn * 2               # double-buffered output block
        acc = th * Wpp * tn * 4                  # single rolled accumulator
        tmp = 2 * th * Wpp * 3 * tn * 4          # dot result / roll transients
        return xin + wgt + outb + acc + tmp + (2 << 20)

    th = None
    for cand in sorted((d for d in range(1, H + 1) if H % d == 0),
                       reverse=True):
        if est(cand) <= budget:
            th = cand
            break
    if th is None:
        # TODO(synk): pathologically wide rows; fall back to im2col GEMM.
        return _conv3x3_im2col(x, w_f, b_p, relu)

    nb = H // th
    xp = jnp.pad(x.astype(jnp.bfloat16),
                 ((0, 0), (1, 1), (1, Wpp - W - 1), (0, Kp - C)))
    if nb == 1:
        xb = xp                                      # (Nb, H+2, Wpp, Kp)
    else:
        # Overlapping row bands with a 1-row halo keep the fused path alive
        # for large feature maps instead of falling to the 9x-traffic im2col.
        xb = jnp.stack([xp[:, b * th:b * th + th + 2] for b in range(nb)],
                       axis=1).reshape(Nb * nb, th + 2, Wpp, Kp)

    NB = Nb * nb
    out = pl.pallas_call(
        partial(_conv3x3_kernel, H=th, W=W, relu=relu),
        out_shape=jax.ShapeDtypeStruct((NB, th, W, Np), jnp.bfloat16),
        grid_spec=pltpu.PrefetchScalarGridSpec(
            num_scalar_prefetch=0,
            grid=(NB, Np // tn, nk),
            in_specs=[pl.BlockSpec((1, th + 2, Wpp, tk),
                                   lambda n, j, k: (n, 0, 0, k)),
                      pl.BlockSpec((3, tk, 3 * tn), lambda n, j, k: (0, k, j)),
                      pl.BlockSpec((1, tn), lambda n, j, k: (0, j))],
            out_specs=pl.BlockSpec((1, th, W, tn),
                                   lambda n, j, k: (n, 0, 0, j)),
            scratch_shapes=[pltpu.VMEM((th * Wpp, tn), jnp.float32)]),
        compiler_params=_compiler_params(("parallel", "parallel", "arbitrary")),
    )(xb, w_f, b_p)

    if nb != 1:
        out = out.reshape(Nb, H, W, Np)
    return out


# ----------------------------------------------------------------------------
# Plain-JAX glue: bilinear resize and adaptive avg pool as matrix contractions
# ----------------------------------------------------------------------------
def _interp_matrix(in_size, out_size):
    """Row-interpolation matrix matching torch bilinear, align_corners=False."""
    m = np.zeros((out_size, in_size), np.float32)
    scale = in_size / out_size
    for o in range(out_size):
        d = (o + 0.5) * scale - 0.5
        d = min(max(d, 0.0), in_size - 1.0)
        i0 = int(np.floor(d))
        i0 = min(max(i0, 0), in_size - 1)
        i1 = min(i0 + 1, in_size - 1)
        f = d - i0
        m[o, i0] += 1.0 - f
        m[o, i1] += f
    return jnp.asarray(m)


def resize_bilinear(x, out_h, out_w):
    N, H, W, C = x.shape
    if (out_h, out_w) == (H, W):
        return x
    Rh = _interp_matrix(H, out_h)
    Rw = _interp_matrix(W, out_w)
    y = jnp.einsum('Oh,Pw,nhwc->nOPc', Rh, Rw, x.astype(jnp.float32))
    return y.astype(x.dtype)


def _pool_matrix(in_size, out_size):
    m = np.zeros((out_size, in_size), np.float32)
    for i in range(out_size):
        s = (i * in_size) // out_size
        e = -((-(i + 1) * in_size) // out_size)      # ceil
        m[i, s:e] = 1.0 / (e - s)
    return jnp.asarray(m)


def adaptive_avg_pool(x, scale):
    N, H, W, C = x.shape
    Ah = _pool_matrix(H, scale)
    Aw = _pool_matrix(W, scale)
    y = jnp.einsum('Ih,Jw,nhwc->nIJc', Ah, Aw, x.astype(jnp.float32))
    return y.astype(x.dtype)


# ----------------------------------------------------------------------------
# Parameter construction (deterministic, mirrors init_weights; BN folded and
# weights pre-padded / pre-cast / fused-dx laid out so the forward never
# touches weight layout).
# ----------------------------------------------------------------------------
_BN_EPS = 1e-5
_BN_SCALE = 1.0 / math.sqrt(1.0 + _BN_EPS)   # gamma=1, var=1, mean=0, beta=0


def _kaiming_uniform(key, shape, fan_in):
    bound = math.sqrt(6.0 / fan_in)          # gain=sqrt(2), kaiming uniform
    return jax.random.uniform(key, shape, jnp.float32, -bound, bound)


def _prep_w1(key, cin, cout, scale=1.0):
    w = _kaiming_uniform(key, (cin, cout), fan_in=cin) * scale
    kp, npd = _round_up(cin, 128), _round_up(cout, 128)
    wp = jnp.pad(w, ((0, kp - cin), (0, npd - cout))).astype(jnp.bfloat16)
    bp = jnp.zeros((1, npd), jnp.float32)
    return wp, bp


def _prep_w3(key, segs, cout, scale=1.0):
    """3x3 weight in fused-dx layout (3, Kp, 3*Np).

    segs: list of (real_channels, slot_channels) input segments, so concats of
    lane-padded activations can be consumed without compaction."""
    cin_real = sum(r for r, _ in segs)
    w = _kaiming_uniform(key, (3, 3, cin_real, cout),
                         fan_in=cin_real * 9) * scale
    kp = _round_up(sum(s for _, s in segs), 128)
    npd = _round_up(cout, 128)
    tn = _pick_tn(npd)
    wp = jnp.zeros((3, 3, kp, npd), jnp.float32)
    ro = so = 0
    for r, s in segs:
        wp = wp.at[:, :, so:so + r, :cout].set(w[:, :, ro:ro + r, :])
        ro += r
        so += s
    # (dy, dx, k, j, t) -> (dy, k, j, dx, t) -> (3, Kp, 3*Np): for output tile
    # j the three dx taps sit in adjacent tn-wide column blocks.
    wf = (wp.reshape(3, 3, kp, npd // tn, tn)
            .transpose(0, 2, 3, 1, 4)
            .reshape(3, kp, 3 * npd)
            .astype(jnp.bfloat16))
    bp = jnp.zeros((1, npd), jnp.float32)
    return wf, bp


def make_params(key, encoder_channels, num_classes, pool_scales=(1, 2, 3, 6),
                fpn_dim=256):
    *lateral_channels, channels = list(encoder_channels)
    fd_pad = _round_up(fpn_dim, 128)
    keys = iter(jax.random.split(key, 64))
    p = {}

    # PPM 1x1 convs: channels -> 512, bias=False, BN folded (scale only)
    p["ppm_conv"] = [_prep_w1(next(keys), channels, 512, _BN_SCALE)
                     for _ in pool_scales]

    # ppm_last_conv: 3x3, (channels + 4*512) -> fpn_dim (concat is compact:
    # feat_last raw + 512-wide conv outputs which are already lane-aligned).
    segs = [(channels, channels)] + [(512, 512)] * len(pool_scales)
    p["ppm_last_conv"] = _prep_w3(next(keys), segs, fpn_dim, _BN_SCALE)

    # fpn_in 1x1 convs (built on reversed lateral channels), bias=False
    p["fpn_in"] = [_prep_w1(next(keys), c, fpn_dim, _BN_SCALE)
                   for c in lateral_channels[::-1]]

    # fpn_out 3x3 convs consume the lane-padded fpn_dim activations directly.
    p["fpn_out"] = [_prep_w3(next(keys), [(fpn_dim, fd_pad)], fpn_dim,
                             _BN_SCALE) for _ in lateral_channels]

    # conv_last: ConvBnRelu 3x3 on the concat of (L+1) lane-padded fpn tensors
    # (segment-aware weight placement), then 1x1 -> classes.
    segs = [(fpn_dim, fd_pad)] * (len(lateral_channels) + 1)
    p["conv_last0"] = _prep_w3(next(keys), segs, fpn_dim, _BN_SCALE)
    p["conv_last1"] = _prep_w1(next(keys), fpn_dim, num_classes, 1.0)
    return p


# ----------------------------------------------------------------------------
# UPerNet forward (semantics of the PyTorch module, eval mode)
# ----------------------------------------------------------------------------
def upernet_forward(params, features_nchw, num_classes, fpn_dim=256,
                    pool_scales=(1, 2, 3, 6), do_interpolate=True):
    input_image = features_nchw[0]
    final_h, final_w = input_image.shape[2], input_image.shape[3]

    # NCHW -> NHWC; cast to bf16 ONCE at the entry.  All conv outputs stay
    # bf16 with lane-padded channels to cut inter-kernel HBM traffic.
    feats = [jnp.transpose(f, (0, 2, 3, 1)).astype(jnp.bfloat16)
             for f in features_nchw[1:]]
    *mid_feats, feat_last = feats
    h, w = feat_last.shape[1], feat_last.shape[2]

    # --- PPM ---
    ppm_out = [feat_last]
    for scale, (pw, pb) in zip(pool_scales, params["ppm_conv"]):
        pooled = adaptive_avg_pool(feat_last, scale)
        pooled = resize_bilinear(pooled, h, w)
        ppm_out.append(conv1x1(pooled, pw, pb, relu=True))
    ppm_out = jnp.concatenate(ppm_out, axis=-1)
    f = conv3x3(ppm_out, *params["ppm_last_conv"], relu=True)

    # --- FPN top-down ---
    fpn_feature_list = [f]
    for i, feat in enumerate(mid_feats[::-1]):
        feat_x = conv1x1(feat, *params["fpn_in"][i], relu=True)
        f = feat_x + resize_bilinear(f, feat_x.shape[1], feat_x.shape[2])
        fpn_feature_list.append(conv3x3(f, *params["fpn_out"][i], relu=True))
    fpn_feature_list = fpn_feature_list[::-1]

    out_h, out_w = fpn_feature_list[0].shape[1], fpn_feature_list[0].shape[2]
    fusion_list = [fpn_feature_list[0]] + [
        resize_bilinear(ff, out_h, out_w) for ff in fpn_feature_list[1:]]
    fusion_out = jnp.concatenate(fusion_list, axis=-1)

    # TODO(synk): nn.Dropout2d is identity in eval mode; no RNG dropout here.
    x = conv3x3(fusion_out, *params["conv_last0"], relu=True)
    x = conv1x1(x, *params["conv_last1"], relu=False, out_dtype=jnp.float32)

    if do_interpolate:
        # Resize on the lane-padded (128-ch) tensor so the epilogue stores
        # stay lane-dense; slice to num_classes only at the very end.
        x = resize_bilinear(x, final_h, final_w)
    x = x[..., :num_classes]

    x = jnp.transpose(x, (0, 3, 1, 2))       # back to NCHW
    if num_classes == 1:
        x = x[:, 0]
    return x


# ----------------------------------------------------------------------------
if __name__ == "__main__":
    key = jax.random.PRNGKey(0)
    k_img, k1, k2, k3, k_par = jax.random.split(key, 5)

    # Light self-check of the fused 3x3 kernel against a plain-JAX reference.
    xc = jax.random.normal(jax.random.PRNGKey(1), (2, 8, 8, 16), jnp.float32)
    wf_c, bf_c = _prep_w3(jax.random.PRNGKey(2), [(16, 16)], 32)
    got = conv3x3(xc, wf_c, bf_c, relu=True).astype(jnp.float32)[..., :32]
    w4 = _unfuse_w3(wf_c).astype(jnp.float32)
    xpad = jnp.pad(xc, ((0, 0), (1, 1), (1, 1), (0, 0)))
    ref = sum(jnp.einsum('nhwc,co->nhwo', xpad[:, dy:dy + 8, dx:dx + 8, :],
                         w4[dy, dx, :16, :32])
              for dy in range(3) for dx in range(3))
    ref = jnp.maximum(ref, 0.0)
    rel = float(jnp.max(jnp.abs(got - ref)) / (jnp.max(jnp.abs(ref)) + 1e-6))
    assert rel < 0.05, f"conv3x3 self-check failed, rel err {rel}"

    # encoder_channels = (8, 16, 32): two lateral levels + final level
    encoder_channels = (8, 16, 32)
    num_classes = 5
    fpn_dim = 32

    input_image = jax.random.normal(k_img, (2, 3, 32, 32), jnp.float32)
    feat1 = jax.random.normal(k1, (2, 8, 16, 16), jnp.float32)
    feat2 = jax.random.normal(k2, (2, 16, 8, 8), jnp.float32)
    feat_last = jax.random.normal(k3, (2, 32, 4, 4), jnp.float32)
    features = [input_image, feat1, feat2, feat_last]

    params = make_params(k_par, encoder_channels, num_classes, fpn_dim=fpn_dim)

    fwd = jax.jit(partial(upernet_forward, num_classes=num_classes,
                          fpn_dim=fpn_dim))
    out = fwd(params, features)
    out = jax.block_until_ready(out)

    assert out.shape == (2, num_classes, 32, 32), out.shape
    assert jnp.all(jnp.isfinite(out))
    print("KERNEL_OK")
</pallas_src>

<mosaic_0001>
module attributes {stable_mosaic.version = 11 : i64} {
  func.func @_conv3x3_kernel(%arg0: i32, %arg1: i32, %arg2: i32, %arg3: memref<1x10x16x128xbf16, #tpu.memory_space<vmem>>, %arg4: memref<3x128x384xbf16, #tpu.memory_space<vmem>>, %arg5: memref<1x128xf32, #tpu.memory_space<vmem>>, %arg6: memref<1x8x8x128xbf16, #tpu.memory_space<vmem>>, %arg7: memref<128x128xf32, #tpu.memory_space<vmem>>) attributes {dimension_semantics = [#tpu.dimension_semantics<parallel>, #tpu.dimension_semantics<parallel>, #tpu.dimension_semantics<arbitrary>], iteration_bounds = array<i64: 2, 1, 1>, scalar_prefetch = 0 : i64, scratch_operands = 1 : i64, tpu.core_type = #tpu.core_type<tc>, window_params = [{transform_indices = @transform_0, window_bounds = array<i64: 1, 10, 16, 128>}, {transform_indices = @transform_1, window_bounds = array<i64: 3, 128, 384>}, {transform_indices = @transform_2, window_bounds = array<i64: 1, 128>}, {transform_indices = @transform_3, window_bounds = array<i64: 1, 8, 8, 128>}]} {
    %c0_i32 = arith.constant 0 : i32
    %0 = arith.cmpi eq, %arg2, %c0_i32 : i32
    %1 = arith.extui %0 : i1 to i32
    %c0_i32_0 = arith.constant 0 : i32
    %2 = arith.cmpi ne, %1, %c0_i32_0 : i32
    scf.if %2 {
      %cst_39 = arith.constant 0.000000e+00 : f32
      %54 = vector.broadcast %cst_39 : f32 to vector<128x128xf32>
      %c0_40 = arith.constant 0 : index
      %c0_41 = arith.constant 0 : index
      %55 = vector.load %arg7[%c0_40, %c0_41] : memref<128x128xf32, #tpu.memory_space<vmem>>, vector<128x128xf32>
      tpu.vector_store %arg7[%c0_40, %c0_41], %54 {strides = array<i32>} : memref<128x128xf32, #tpu.memory_space<vmem>>, vector<128x128xf32>,
    } else {
    }
    %c0 = arith.constant 0 : index
    %c0_1 = arith.constant 0 : index
    %c0_2 = arith.constant 0 : index
    %c0_3 = arith.constant 0 : index
    %3 = vector.load %arg3[%c0, %c0_1, %c0_2, %c0_3] : memref<1x10x16x128xbf16, #tpu.memory_space<vmem>>, vector<1x8x16x128xbf16>
    %4 = vector.shape_cast %3 : vector<1x8x16x128xbf16> to vector<8x16x128xbf16>
    %5 = vector.shape_cast %4 : vector<8x16x128xbf16> to vector<128x128xbf16>
    %c0_4 = arith.constant 0 : index
    %c0_5 = arith.constant 0 : index
    %c0_6 = arith.constant 0 : index
    %6 = vector.load %arg4[%c0_4, %c0_5, %c0_6] : memref<3x128x384xbf16, #tpu.memory_space<vmem>>, vector<1x128x384xbf16>
    %7 = vector.shape_cast %6 : vector<1x128x384xbf16> to vector<128x384xbf16>
    %cst = arith.constant dense<0.000000e+00> : vector<128x384xf32>
    %8 = tpu.matmul %5, %7, %cst {dimension_numbers = #tpu.dot_dimension_numbers<[1], [0], [0], [1], [0, 0, 1, 1], [], []>} : vector<128x128xbf16>, vector<128x384xbf16>, vector<128x384xf32> -> vector<128x384xf32>
    %9 = vector.extract_strided_slice %8 {offsets = [0, 0], sizes = [128, 128], strides = [1, 1]} : vector<128x384xf32> to vector<128x128xf32>
    %10 = vector.extract_strided_slice %8 {offsets = [0, 128], sizes = [128, 128], strides = [1, 1]} : vector<128x384xf32> to vector<128x128xf32>
    %c127_i32 = arith.constant 127 : i32
    %11 = tpu.dynamic_rotate %10 by %c127_i32 dim 0 : vector<128x128xf32>, i32 -> vector<128x128xf32>
    %12 = arith.addf %9, %11 : vector<128x128xf32>
    %13 = vector.extract_strided_slice %8 {offsets = [0, 256], sizes = [128, 128], strides = [1, 1]} : vector<128x384xf32> to vector<128x128xf32>
    %c126_i32 = arith.constant 126 : i32
    %14 = tpu.dynamic_rotate %13 by %c126_i32 dim 0 : vector<128x128xf32>, i32 -> vector<128x128xf32>
    %15 = arith.addf %12, %14 : vector<128x128xf32>
    %c0_7 = arith.constant 0 : index
    %c0_8 = arith.constant 0 : index
    %16 = vector.load %arg7[%c0_7, %c0_8] : memref<128x128xf32, #tpu.memory_space<vmem>>, vector<128x128xf32>
    %17 = arith.addf %16, %15 : vector<128x128xf32>
    %c0_9 = arith.constant 0 : index
    %c0_10 = arith.constant 0 : index
    %18 = vector.load %arg7[%c0_9, %c0_10] : memref<128x128xf32, #tpu.memory_space<vmem>>, vector<128x128xf32>
    tpu.vector_store %arg7[%c0_9, %c0_10], %17 {strides = array<i32>} : memref<128x128xf32, #tpu.memory_space<vmem>>, vector<128x128xf32>,
    %c0_11 = arith.constant 0 : index
    %c1 = arith.constant 1 : index
    %c0_12 = arith.constant 0 : index
    %c0_13 = arith.constant 0 : index
    %19 = vector.load %arg3[%c0_11, %c1, %c0_12, %c0_13] : memref<1x10x16x128xbf16, #tpu.memory_space<vmem>>, vector<1x8x16x128xbf16>
    %20 = vector.shape_cast %19 : vector<1x8x16x128xbf16> to vector<8x16x128xbf16>
    %21 = vector.shape_cast %20 : vector<8x16x128xbf16> to vector<128x128xbf16>
    %c1_14 = arith.constant 1 : index
    %c0_15 = arith.constant 0 : index
    %c0_16 = arith.constant 0 : index
    %22 = vector.load %arg4[%c1_14, %c0_15, %c0_16] : memref<3x128x384xbf16, #tpu.memory_space<vmem>>, vector<1x128x384xbf16>
    %23 = vector.shape_cast %22 : vector<1x128x384xbf16> to vector<128x384xbf16>
    %cst_17 = arith.constant dense<0.000000e+00> : vector<128x384xf32>
    %24 = tpu.matmul %21, %23, %cst_17 {dimension_numbers = #tpu.dot_dimension_numbers<[1], [0], [0], [1], [0, 0, 1, 1], [], []>} : vector<128x128xbf16>, vector<128x384xbf16>, vector<128x384xf32> -> vector<128x384xf32>
    %25 = vector.extract_strided_slice %24 {offsets = [0, 0], sizes = [128, 128], strides = [1, 1]} : vector<128x384xf32> to vector<128x128xf32>
    %26 = vector.extract_strided_slice %24 {offsets = [0, 128], sizes = [128, 128], strides = [1, 1]} : vector<128x384xf32> to vector<128x128xf32>
    %c127_i32_18 = arith.constant 127 : i32
    %27 = tpu.dynamic_rotate %26 by %c127_i32_18 dim 0 : vector<128x128xf32>, i32 -> vector<128x128xf32>
    %28 = arith.addf %25, %27 : vector<128x128xf32>
    %29 = vector.extract_strided_slice %24 {offsets = [0, 256], sizes = [128, 128], strides = [1, 1]} : vector<128x384xf32> to vector<128x128xf32>
    %c126_i32_19 = arith.constant 126 : i32
    %30 = tpu.dynamic_rotate %29 by %c126_i32_19 dim 0 : vector<128x128xf32>, i32 -> vector<128x128xf32>
    %31 = arith.addf %28, %30 : vector<128x128xf32>
    %c0_20 = arith.constant 0 : index
    %c0_21 = arith.constant 0 : index
    %32 = vector.load %arg7[%c0_20, %c0_21] : memref<128x128xf32, #tpu.memory_space<vmem>>, vector<128x128xf32>
    %33 = arith.addf %32, %31 : vector<128x128xf32>
    %c0_22 = arith.constant 0 : index
    %c0_23 = arith.constant 0 : index
    %34 = vector.load %arg7[%c0_22, %c0_23] : memref<128x128xf32, #tpu.memory_space<vmem>>, vector<128x128xf32>
    tpu.vector_store %arg7[%c0_22, %c0_23], %33 {strides = array<i32>} : memref<128x128xf32, #tpu.memory_space<vmem>>, vector<128x128xf32>,
    %c0_24 = arith.constant 0 : index
    %c2 = arith.constant 2 : index
    %c0_25 = arith.constant 0 : index
    %c0_26 = arith.constant 0 : index
    %35 = vector.load %arg3[%c0_24, %c2, %c0_25, %c0_26] : memref<1x10x16x128xbf16, #tpu.memory_space<vmem>>, vector<1x8x16x128xbf16>
    %36 = vector.shape_cast %35 : vector<1x8x16x128xbf16> to vector<8x16x128xbf16>
    %37 = vector.shape_cast %36 : vector<8x16x128xbf16> to vector<128x128xbf16>
    %c2_27 = arith.constant 2 : index
    %c0_28 = arith.constant 0 : index
    %c0_29 = arith.constant 0 : index
    %38 = vector.load %arg4[%c2_27, %c0_28, %c0_29] : memref<3x128x384xbf16, #tpu.memory_space<vmem>>, vector<1x128x384xbf16>
    %39 = vector.shape_cast %38 : vector<1x128x384xbf16> to vector<128x384xbf16>
    %cst_30 = arith.constant dense<0.000000e+00> : vector<128x384xf32>
    %40 = tpu.matmul %37, %39, %cst_30 {dimension_numbers = #tpu.dot_dimension_numbers<[1], [0], [0], [1], [0, 0, 1, 1], [], []>} : vector<128x128xbf16>, vector<128x384xbf16>, vector<128x384xf32> -> vector<128x384xf32>
    %41 = vector.extract_strided_slice %40 {offsets = [0, 0], sizes = [128, 128], strides = [1, 1]} : vector<128x384xf32> to vector<128x128xf32>
    %42 = vector.extract_strided_slice %40 {offsets = [0, 128], sizes = [128, 128], strides = [1, 1]} : vector<128x384xf32> to vector<128x128xf32>
    %c127_i32_31 = arith.constant 127 : i32
    %43 = tpu.dynamic_rotate %42 by %c127_i32_31 dim 0 : vector<128x128xf32>, i32 -> vector<128x128xf32>
    %44 = arith.addf %41, %43 : vector<128x128xf32>
    %45 = vector.extract_strided_slice %40 {offsets = [0, 256], sizes = [128, 128], strides = [1, 1]} : vector<128x384xf32> to vector<128x128xf32>
    %c126_i32_32 = arith.constant 126 : i32
    %46 = tpu.dynamic_rotate %45 by %c126_i32_32 dim 0 : vector<128x128xf32>, i32 -> vector<128x128xf32>
    %47 = arith.addf %44, %46 : vector<128x128xf32>
    %c0_33 = arith.constant 0 : index
    %c0_34 = arith.constant 0 : index
    %48 = vector.load %arg7[%c0_33, %c0_34] : memref<128x128xf32, #tpu.memory_space<vmem>>, vector<128x128xf32>
    %49 = arith.addf %48, %47 : vector<128x128xf32>
    %c0_35 = arith.constant 0 : index
    %c0_36 = arith.constant 0 : index
    %50 = vector.load %arg7[%c0_35, %c0_36] : memref<128x128xf32, #tpu.memory_space<vmem>>, vector<128x128xf32>
    tpu.vector_store %arg7[%c0_35, %c0_36], %49 {strides = array<i32>} : memref<128x128xf32, #tpu.memory_space<vmem>>, vector<128x128xf32>,
    %c0_i32_37 = arith.constant 0 : i32
    %51 = arith.cmpi eq, %arg2, %c0_i32_37 : i32
    %52 = arith.extui %51 : i1 to i32
    %c0_i32_38 = arith.constant 0 : i32
    %53 = arith.cmpi ne, %52, %c0_i32_38 : i32
    scf.if %53 {
      %c0_39 = arith.constant 0 : index
      %c0_40 = arith.constant 0 : index
      %54 = vector.load %arg7[%c0_39, %c0_40] : memref<128x128xf32, #tpu.memory_space<vmem>>, vector<128x128xf32>
      %55 = vector.shape_cast %54 : vector<128x128xf32> to vector<8x16x128xf32>
      %56 = vector.extract_strided_slice %55 {offsets = [0, 0, 0], sizes = [8, 8, 128], strides = [1, 1, 1]} : vector<8x16x128xf32> to vector<8x8x128xf32>
      %c0_41 = arith.constant 0 : index
      %c0_42 = arith.constant 0 : index
      %57 = vector.load %arg5[%c0_41, %c0_42] : memref<1x128xf32, #tpu.memory_space<vmem>>, vector<1x128xf32>
      %58 = vector.shape_cast %57 : vector<1x128xf32> to vector<1x1x128xf32>
      %59 = vector.broadcast %58 : vector<1x1x128xf32> to vector<8x8x128xf32>
      %60 = arith.addf %56, %59 : vector<8x8x128xf32>
      %cst_43 = arith.constant 0.000000e+00 : f32
      %61 = vector.broadcast %cst_43 : f32 to vector<8x8x128xf32>
      %62 = arith.maximumf %60, %61 : vector<8x8x128xf32>
      %63 = vector.shape_cast %62 : vector<8x8x128xf32> to vector<1x8x8x128xf32>
      %64 = arith.truncf %63 : vector<1x8x8x128xf32> to vector<1x8x8x128xbf16>
      %c0_44 = arith.constant 0 : index
      %c0_45 = arith.constant 0 : index
      %c0_46 = arith.constant 0 : index
      %c0_47 = arith.constant 0 : index
      %65 = vector.load %arg6[%c0_44, %c0_45, %c0_46, %c0_47] : memref<1x8x8x128xbf16, #tpu.memory_space<vmem>>, vector<1x8x8x128xbf16>
      tpu.vector_store %arg6[%c0_44, %c0_45, %c0_46, %c0_47], %64 {strides = array<i32>} : memref<1x8x8x128xbf16, #tpu.memory_space<vmem>>, vector<1x8x8x128xbf16>,
    } else {
    }
    return
  }
  func.func @transform_0(%arg0: i32, %arg1: i32, %arg2: i32) -> (i32, i32, i32, i32) {
    %c0_i32 = arith.constant 0 : i32
    %c0_i32_0 = arith.constant 0 : i32
    %c0_i32_1 = arith.constant 0 : i32
    return %arg0, %c0_i32, %c0_i32_0, %arg2 : i32, i32, i32, i32
  }
  func.func @transform_1(%arg0: i32, %arg1: i32, %arg2: i32) -> (i32, i32, i32) {
    %c0_i32 = arith.constant 0 : i32
    %c0_i32_0 = arith.constant 0 : i32
    return %c0_i32, %arg2, %arg1 : i32, i32, i32
  }
  func.func @transform_2(%arg0: i32, %arg1: i32, %arg2: i32) -> (i32, i32) {
    %c0_i32 = arith.constant 0 : i32
    %c0_i32_0 = arith.constant 0 : i32
    return %c0_i32, %arg1 : i32, i32
  }
  func.func @transform_3(%arg0: i32, %arg1: i32, %arg2: i32) -> (i32, i32, i32, i32) {
    %c0_i32 = arith.constant 0 : i32
    %c0_i32_0 = arith.constant 0 : i32
    %c0_i32_1 = arith.constant 0 : i32
    return %arg0, %c0_i32, %c0_i32_0, %arg1 : i32, i32, i32, i32
  }
}

</mosaic_0001>

<bundles_post_ra>
// kernel: tpu_custom_call.1
= control target key start
LH: loop header
LB: loop body
LE: loop exit
PB: predicated region body
PF: predicated region fallthrough
CT: control target
= control target key end

     0   :  { %8 = vsyncpa [#allocation4], 0  ;;  %s3282_s0 = inlined_call_operand.hbm [shape: bf16[2,10,16,128], index: 0, kind: input, shape index: {}]   ;;  %s3283_s1 = inlined_call_operand.hbm [shape: bf16[3,128,384], index: 1, kind: input, shape index: {}]   ;;  %s3284_s2 = inlined_call_operand.vmem [shape: f32[1,128], index: 2, kind: input, shape index: {}]   ;;  %s3285_s3 = inlined_call_operand.hbm [shape: bf16[2,8,8,128], index: 3, kind: output, shape index: {}]  }
   0x1   :  { %10 = vsyncpa [#allocation4 + $0x1], 0 }
   0x2   :  { %11 = vsyncpa [#allocation7], 0 }
   0x3   :  { %12 = vsyncpa [#allocation5], 0 }
   0x4   :  { %14 = vsyncpa [#allocation5 + $0x1], 0  ;;  %s2846_s12 = smov 0   ;;  %s2848_s13 = smov 0  }
   0x5   :  { %s2850_s14 = smov 0   ;;  %s2852_s15 = smov 0  }
   0x6   :  { %s2854_s16 = smov 0   ;;  %s2856_s17 = smov 0  }
   0x7 LB: > { %s2013_s18 = sadd.s32 4294967295, %s2817_s17   ;;  %s2014_s19 = sadd.s32 4294967294, %s2817_s17   ;;  %s2817_s17 = sphi %s2856_s17, %s20_s17   ;;  %s2813_s16 = sphi %s2854_s16, %s3296_s16   ;;  %s2809_s15 = sphi %s2852_s15, %s3295_s15   ;;  %s2805_s14 = sphi %s2850_s14, %s3294_s14   ;;  %s2801_s13 = sphi %s2848_s13, %s3293_s13   ;;  %s2797_s12 = sphi %s2846_s12, %s3292_s12  }
   0x8   : > { %p61_p0 = scmp.ne.s32.totalorder %s2801_s13, %s2797_s12  ;;  %p2880_p1 = scmp.eq.s32.totalorder %s2013_s18, 0 }
   0x9   : > { %p2884_p2 = scmp.eq.s32.totalorder %s2013_s18, 1  ;;  %p147_p3 = scmp.eq.s32.totalorder %s2014_s19, 1 }
   0xa   : > { %p2890_p4 = por %p2880_p1, %p61_p0  ;;  %p2015_p5 = scmp.ge.s32.totalorder %s2817_s17, 1 }
   0xb   : > { %p2895_p6 = por %p147_p3, %p61_p0  ;;  %p154_p7 = scmp.lt.s32.totalorder %s2817_s17, 3 }
   0xc   : > { %s171_s26 = sshll.u32 %s3283_s1, 4  ;;  %s2819_s28 = smov [#allocation6]   ;;  %s172_s26 = int_to_ptr.hbm [resolvable:$true] %s171_s26 }
   0xd   : > { %p2903_p8 = pnand %p2015_p5, %p154_p7  ;;  %s173_s29 = sshll.u32 %s2819_s28, 4  ;;  %s174_s29 = int_to_ptr.vmem [resolvable:$true] %s173_s29 }
   0xe   : > { %p2018_p11 = scmp.ge.s32.totalorder %s2817_s17, 2  ;;  %s2820_s30 = smov 192  }
   0xf   : > { %p2599_p9 = pneg %p2903_p8  ;;  %s2821_s4 = smov 12  }
  0x10   : > { %s39_s5 = sadd.s32 1, %s2813_s16  ;;  %s48_s6 = sadd.s32 1, %s2805_s14 }
  0x11   : > { %p2600_p10 = pnand %p2599_p9, %p2880_p1  ;;  %p41_p12 = scmp.ge.s32.totalorder %s39_s5, 2 }
  0x12   : > { %p55_p13 = scmp.ne.s32.totalorder %s2805_s14, %s2801_s13  ;;  %p56_p0 = scmp.eq.s32.totalorder %s2817_s17, 0 }
  0x13   : > { %2602 = dma.hbm_to_vmem [thread:$0]  (!%p2600_p10), %s172_s26, 9216, %s174_s29, [#allocation7], %s2820_s30, %s2820_s30, %s2821_s4  }
  0x14   : > { %s3298_s5 = smov (%p41_p12, %s39_s5), 0  ;;  %p57_p3 = por %p56_p0, %p55_p13 }
  0x15   : > { %p2921_p5 = por %p2884_p2, %p55_p13  ;;  %s43_s8 = ssub.s32 %s2813_s16, %s3298_s5 }
  0x16   : > { %p2612_p7 = scmp.lt.s32.totalorder %s2817_s17, 2  ;;  %p46_p9 = scmp.eq.s32.totalorder %s43_s8, 0 }
  0x17   : > { %s193_s9 = sand.u32 1, %s2805_s14   ;;  %s2589_s18 = smul.u32 80, %s2813_s16 }
  0x18   : > { %s2588_s10 = smul.u32 80, %s193_s9  ;;  %p2604_p10 = pnand %p2612_p7, %p57_p3 }
  0x19   : > { %s2930_s11 = scalar_select %p46_p9, %s2805_s14, %s48_s6  }
  0x1a   : > { %s197_s19 = scalar_lea.vmem [#allocation3], %s2588_s10  ;;  %s203_s28 = scalar_lea.hbm %s3282_s0, %s2589_s18 }
  0x1b   : > { %s206_s24 = sshll.u32 %s197_s19, 4  ;;  %s204_s21 = sshll.u32 %s203_s28, 4  ;;  %s207_s24 = int_to_ptr.vmem [resolvable:$true] %s206_s24  ;;  %s205_s21 = int_to_ptr.hbm [resolvable:$true] %s204_s21 }
  0x1c   : > { %s194_s29 = scalar_lea.sflag [#allocation4], %s193_s9  ;;  %s2822_s30 = smov 64  }
  0x1d   : > { %s2823_s4 = smov 4   ;;  %218 = sbr.rel (%p2903_p8) target bundleno = 506 (0x1fa), region = 32 }
  0x1e   : > { %2606 = dma.hbm_to_vmem [thread:$0]  (!%p2604_p10), %s205_s21, 1280, %s207_s24, %s194_s29, %s2822_s30, %s2822_s30, %s2823_s4  }
  0x1f   : > { %s2939_s6 = sand.u32 (!%p2903_p8), 1, %s2801_s13  }
  0x20   : > { %s2590_s8 = smul.u32 (!%p2903_p8), 80, %s2939_s6  ;;  %s221_s10 = scalar_lea.sflag (!%p2903_p8), [#allocation4], %s2939_s6 }
  0x22   : > { %s2943_s19 = scalar_lea.vmem [#allocation3], %s2590_s8 }
  0x23   : > { %2784 = dma.done.wait (%p2890_p4), %s221_s10, 1280  }
  0x24   : > { %2786 = vsyncadd (%p2890_p4), %s221_s10, 4294966016 }
  0x25   : > { %2788 = dma.done.wait (%p2880_p1), [#allocation7], 9216  }
  0x26   : > { %2790 = vsyncadd (%p2880_p1), [#allocation7], 4294958080  ;;  %v2141_v0 = vld [vmem:[#allocation6 + $0xa8] sm:$0xf]  ;;  %v2474_v1 = vld [vmem:[#allocation6 + $0xb0] sm:$0xf0] }
  0x27   : > { %v2129_v2 = vld [vmem:[#allocation6 + $0x90] sm:$0xf]  ;;  %v2142_v3 = vor.u32 %v2474_v1, %v2141_v0  ;;  %v2471_v4 = vld [vmem:[#allocation6 + $0x98] sm:$0xf0]  ;;  %v2117_v6 = vld [vmem:[#allocation6 + $0x78] sm:$0xf] }
  0x28   : > { %v2130_v5 = vor.u32 %v2471_v4, %v2129_v2  ;;  %v2468_v7 = vld [vmem:[#allocation6 + $0x80] sm:$0xf0]  ;;  %v2105_v9 = vld [vmem:[#allocation6 + $0x60] sm:$0xf]  ;;  %v2465_v10 = vld [vmem:[#allocation6 + $0x68] sm:$0xf0] }
  0x29   : > { %505 = vmatpush.bf16.msra.mxu0 %v2142_v3  ;;  %2564 = vmatpush.bf16.msra.mxu1 %v2142_v3  ;;  %v2118_v8 = vor.u32 %v2468_v7, %v2117_v6  ;;  %v2106_v11 = vor.u32 %v2465_v10, %v2105_v9  ;;  %v2093_v12 = vld [vmem:[#allocation6 + $0x48] sm:$0xf]  ;;  %v2462_v13 = vld [vmem:[#allocation6 + $0x50] sm:$0xf0]  ;;  %v2081_v15 = vld [vmem:[#allocation6 + $0x30] sm:$0xf] }
  0x2a   : > { %2565 = vmatpush.bf16.msra.mxu2 %v2142_v3  ;;  %2566 = vmatpush.bf16.msra.mxu3 %v2142_v3  ;;  %v2094_v14 = vor.u32 %v2462_v13, %v2093_v12  ;;  %v2459_v16 = vld [vmem:[#allocation6 + $0x38] sm:$0xf0]  ;;  %v2069_v18 = vld [vmem:[#allocation6 + $0x18] sm:$0xf]  ;;  %v2456_v19 = vld [vmem:[#allocation6 + $0x20] sm:$0xf0] }
  0x2b   : > { %v2082_v17 = vor.u32 %v2459_v16, %v2081_v15  ;;  %v2070_v20 = vor.u32 %v2456_v19, %v2069_v18  ;;  %v2057_v21 = vld [vmem:[#allocation6] sm:$0xf]  ;;  %v2453_v22 = vld [vmem:[#allocation6 + $0x8] sm:$0xf0]  ;;  %v2285_v23 = vld [vmem:[#allocation6 + $0x168] sm:$0xf] }
  0x2c   : > { %v2506_v24 = vld [vmem:[#allocation6 + $0x170] sm:$0xf0]  ;;  %v2473_v25 = vld [vmem:[#allocation6 + $0xac] sm:$0xf]  ;;  %v2143_v26 = vld [vmem:[#allocation6 + $0xb4] sm:$0xf0]  ;;  %v2058_v27 = vor.u32 %v2453_v22, %v2057_v21 }
  0x2d   : > { %506 = vmatpush.bf16.msra.mxu0 %v2130_v5  ;;  %2567 = vmatpush.bf16.msra.mxu1 %v2130_v5  ;;  %v2954_v28 = vld [vmem:[%s2943_s19] sm:$0xff]  ;;  %v2957_v29 = vld [vmem:[%s2943_s19 + $0x10] sm:$0xff]  ;;  %v2475_v31 = vld [vmem:[#allocation6 + $0xb8] sm:$0xf0]  ;;  %v2286_v32 = vor.u32 %v2506_v24, %v2285_v23  ;;  %v2146_v33 = vor.u32 %v2473_v25, %v2143_v26  ;;  %s2022_s27 = sshll.u32 %s2939_s6, 5  ;;  %s2540_s18 = sshll.u32 %s2809_s15, 5 }
  0x2e   : > { %2568 = vmatpush.bf16.msra.mxu2 %v2130_v5  ;;  %2569 = vmatpush.bf16.msra.mxu3 %v2130_v5  ;;  %v2149_v30 = vld [vmem:[#allocation6 + $0xb0] sm:$0xf]  ;;  %v2505_v34 = vld [vmem:[#allocation6 + $0x16c] sm:$0xf]  ;;  %v2287_v35 = vld [vmem:[#allocation6 + $0x174] sm:$0xf0]  ;;  %s1894_s26 = scalar_lea.hbm %s3285_s3, %s2540_s18 }
  0x2f   : > { %v2273_v36 = vld [vmem:[#allocation6 + $0x150] sm:$0xf]  ;;  %v2503_v37 = vld [vmem:[#allocation6 + $0x158] sm:$0xf0]  ;;  %v2470_v38 = vld [vmem:[#allocation6 + $0x94] sm:$0xf]  ;;  %v2150_v42 = vor.u32 %v2475_v31, %v2149_v30  ;;  %v2290_v43 = vor.u32 %v2505_v34, %v2287_v35 }
  0x30   : > { %v2131_v39 = vld [vmem:[#allocation6 + $0x9c] sm:$0xf0]  ;;  %v2137_v44 = vld [vmem:[#allocation6 + $0x98] sm:$0xf]  ;;  %v2472_v45 = vld [vmem:[#allocation6 + $0xa0] sm:$0xf0]  ;;  %v2274_v46 = vor.u32 %v2503_v37, %v2273_v36 }
  0x31   : > { %507 = vmatpush.bf16.msra.mxu0 %v2118_v8  ;;  %2570 = vmatpush.bf16.msra.mxu1 %v2118_v8  ;;  %v2960_v40 = vld [vmem:[%s2943_s19 + $0x20] sm:$0xff]  ;;  %v2963_v41 = vld [vmem:[%s2943_s19 + $0x30] sm:$0xff]  ;;  %v2134_v47 = vor.u32 %v2470_v38, %v2131_v39  ;;  %v2261_v50 = vld [vmem:[#allocation6 + $0x138] sm:$0xf]  ;;  %v2138_v54 = vor.u32 %v2472_v45, %v2137_v44  ;;  %s3187_s9 = scalar_lea.vmem [#allocation8], %s2022_s27  ;;  %s1897_s21 = sshll.u32 %s1894_s26, 4  ;;  %s1898_s21 = int_to_ptr.hbm [resolvable:$true] %s1897_s21 }
  0x32   : > { %2571 = vmatpush.bf16.msra.mxu2 %v2118_v8  ;;  %2572 = vmatpush.bf16.msra.mxu3 %v2118_v8  ;;  %v2502_v48 = vld [vmem:[#allocation6 + $0x154] sm:$0xf]  ;;  %v2275_v49 = vld [vmem:[#allocation6 + $0x15c] sm:$0xf0]  ;;  %v2500_v51 = vld [vmem:[#allocation6 + $0x140] sm:$0xf0] }
  0x33   : > { %v2467_v52 = vld [vmem:[#allocation6 + $0x7c] sm:$0xf]  ;;  %v2119_v53 = vld [vmem:[#allocation6 + $0x84] sm:$0xf0]  ;;  %v2278_v55 = vor.u32 %v2502_v48, %v2275_v49  ;;  %v2125_v56 = vld [vmem:[#allocation6 + $0x80] sm:$0xf]  ;;  %v2262_v58 = vor.u32 %v2500_v51, %v2261_v50 }
  0x34   : > { %v2469_v57 = vld [vmem:[#allocation6 + $0x88] sm:$0xf0]  ;;  %v2122_v59 = vor.u32 %v2467_v52, %v2119_v53  ;;  %v2499_v60 = vld [vmem:[#allocation6 + $0x13c] sm:$0xf]  ;;  %v2263_v61 = vld [vmem:[#allocation6 + $0x144] sm:$0xf0] }
  0x35   : > { %508 = vmatpush.bf16.msra.mxu0 %v2106_v11  ;;  %2573 = vmatpush.bf16.msra.mxu1 %v2106_v11  ;;  %v2249_v62 = vld [vmem:[#allocation6 + $0x120] sm:$0xf]  ;;  %v2497_v63 = vld [vmem:[#allocation6 + $0x128] sm:$0xf0]  ;;  %v2464_v0 = vld [vmem:[#allocation6 + $0x64] sm:$0xf]  ;;  %v2126_v2 = vor.u32 %v2469_v57, %v2125_v56  ;;  %v2266_v3 = vor.u32 %v2499_v60, %v2263_v61 }
  0x36   : > { %2574 = vmatpush.bf16.msra.mxu2 %v2106_v11  ;;  %2575 = vmatpush.bf16.msra.mxu3 %v2106_v11  ;;  %v2107_v1 = vld [vmem:[#allocation6 + $0x6c] sm:$0xf0]  ;;  %v2113_v4 = vld [vmem:[#allocation6 + $0x68] sm:$0xf]  ;;  %v2466_v5 = vld [vmem:[#allocation6 + $0x70] sm:$0xf0]  ;;  %v2250_v6 = vor.u32 %v2497_v63, %v2249_v62 }
  0x37   : > { %v2110_v7 = vor.u32 %v2464_v0, %v2107_v1  ;;  %v2496_v8 = vld [vmem:[#allocation6 + $0x124] sm:$0xf]  ;;  %v2251_v9 = vld [vmem:[#allocation6 + $0x12c] sm:$0xf0]  ;;  %v2237_v10 = vld [vmem:[#allocation6 + $0x108] sm:$0xf] }
  0x38   : > { %v2494_v11 = vld [vmem:[#allocation6 + $0x110] sm:$0xf0]  ;;  %v2461_v12 = vld [vmem:[#allocation6 + $0x4c] sm:$0xf]  ;;  %v2095_v13 = vld [vmem:[#allocation6 + $0x54] sm:$0xf0]  ;;  %v2254_v15 = vor.u32 %v2496_v8, %v2251_v9 }
  0x39   : > { %509 = vmatpush.bf16.msra.mxu0 %v2094_v14  ;;  %2576 = vmatpush.bf16.msra.mxu1 %v2094_v14  ;;  %v2970_v16 = vld [vmem:[%s2943_s19 + $0x8] sm:$0xff]  ;;  %v2101_v18 = vld [vmem:[#allocation6 + $0x50] sm:$0xf]  ;;  %v2098_v21 = vor.u32 %v2461_v12, %v2095_v13  ;;  %v2458_v26 = vld [vmem:[#allocation6 + $0x34] sm:$0xf]  ;;  %s1895_s28 = sshll.u32 %s3187_s9, 4  ;;  %s1896_s28 = int_to_ptr.vmem [resolvable:$true] %s1895_s28 }
  0x3a   : > { %2577 = vmatpush.bf16.msra.mxu2 %v2094_v14  ;;  %2578 = vmatpush.bf16.msra.mxu3 %v2094_v14  ;;  %v2114_v14 = vor.u32 %v2466_v5, %v2113_v4  ;;  %v2463_v19 = vld [vmem:[#allocation6 + $0x58] sm:$0xf0]  ;;  %v2493_v22 = vld [vmem:[#allocation6 + $0x10c] sm:$0xf]  ;;  %v2239_v23 = vld [vmem:[#allocation6 + $0x114] sm:$0xf0] }
  0x3b   : > { %v2225_v24 = vld [vmem:[#allocation6 + $0xf0] sm:$0xf]  ;;  %v2491_v25 = vld [vmem:[#allocation6 + $0xf8] sm:$0xf0]  ;;  %v2089_v34 = vld [vmem:[#allocation6 + $0x38] sm:$0xf] }
  0x3c   : > { %v2976_v30 = vld [vmem:[%s2943_s19 + $0x28] sm:$0xff]  ;;  %v2979_v31 = vld [vmem:[%s2943_s19 + $0x38] sm:$0xff]  ;;  %v2460_v35 = vld [vmem:[#allocation6 + $0x40] sm:$0xf0]  ;;  %v2226_v36 = vor.u32 %v2491_v25, %v2225_v24  ;;  %s1882_s15 = scalar_lea.sflag [#allocation5], %s2939_s6  ;;  %s2745_s29 = sshra.s32 %s1898_s21, 4  ;;  %s2746_s29 = int_to_ptr.hbm [resolvable:$true] %s2745_s29 }
  0x3d   : > { %510 = vmatpush.bf16.msra.mxu0 %v2082_v17  ;;  %2579 = vmatpush.bf16.msra.mxu1 %v2082_v17  ;;  %v2490_v38 = vld [vmem:[#allocation6 + $0xf4] sm:$0xf]  ;;  %v2227_v39 = vld [vmem:[#allocation6 + $0xfc] sm:$0xf0]  ;;  %v2455_v44 = vld [vmem:[#allocation6 + $0x1c] sm:$0xf]  ;;  %p2752_p8 = scmp.lt.s32.totalorder %s2746_s29, %s3285_s3 }
  0x3e   : > { %2580 = vmatpush.bf16.msra.mxu2 %v2082_v17  ;;  %2581 = vmatpush.bf16.msra.mxu3 %v2082_v17  ;;  %v2973_v17 = vld [vmem:[%s2943_s19 + $0x18] sm:$0xff]  ;;  %v2077_v48 = vld [vmem:[#allocation6 + $0x20] sm:$0xf]  ;;  %v2452_v56 = vld [vmem:[#allocation6 + $0x4] sm:$0xf]  ;;  %s2747_s30 = scalar_lea.hbm %s2746_s29, 32 }
  0x3f   : > { %v2071_v45 = vld [vmem:[#allocation6 + $0x24] sm:$0xf0]  ;;  %v2457_v49 = vld [vmem:[#allocation6 + $0x28] sm:$0xf0]  ;;  %v2487_v50 = vld [vmem:[#allocation6 + $0xdc] sm:$0xf]  ;;  %p2748_p1 = scmp.ne.s32.totalorder %s2746_s29, %s2747_s30 }
  0x40   : > { %v2074_v52 = vor.u32 %v2455_v44, %v2071_v45  ;;  %v2215_v53 = vld [vmem:[#allocation6 + $0xe4] sm:$0xf0]  ;;  %v2059_v57 = vld [vmem:[#allocation6 + $0xc] sm:$0xf0]  ;;  %v2507_v61 = vld [vmem:[#allocation6 + $0x178] sm:$0xf0]  ;;  %v2078_v62 = vor.u32 %v2457_v49, %v2077_v48 }
  0x41   : > { %511 = vmatpush.bf16.msra.mxu0 %v2070_v20  ;;  %2582 = vmatpush.bf16.msra.mxu1 %v2070_v20  ;;  %v2293_v60 = vld [vmem:[#allocation6 + $0x170] sm:$0xf]  ;;  %v2218_v63 = vor.u32 %v2487_v50, %v2215_v53  ;;  %v2065_v0 = vld [vmem:[#allocation6 + $0x8] sm:$0xf]  ;;  %v2454_v1 = vld [vmem:[#allocation6 + $0x10] sm:$0xf0]  ;;  %p2749_p2 = pnand %p2748_p1, %p2921_p5 }
  0x42   : > { %2583 = vmatpush.bf16.msra.mxu2 %v2070_v20  ;;  %2584 = vmatpush.bf16.msra.mxu3 %v2070_v20  ;;  %v2238_v20 = vor.u32 %v2494_v11, %v2237_v10  ;;  %v2484_v4 = vld [vmem:[#allocation6 + $0xc4] sm:$0xf]  ;;  %v2203_v5 = vld [vmem:[#allocation6 + $0xcc] sm:$0xf0]  ;;  %v2294_v8 = vor.u32 %v2507_v61, %v2293_v60  ;;  %v2539_v9 = vld [vmem:[#allocation6 + $0x238] sm:$0xf0] }
  0x43   : > { %v2429_v10 = vld [vmem:[#allocation6 + $0x228] sm:$0xf]  ;;  %v2538_v11 = vld [vmem:[#allocation6 + $0x230] sm:$0xf0]  ;;  %v2419_v13 = vld [vmem:[#allocation6 + $0x21c] sm:$0xf0]  ;;  %p2750_p4 = pneg %p2749_p2 }
  0x44   : > { %v2534_v12 = vld [vmem:[#allocation6 + $0x214] sm:$0xf]  ;;  %v2536_v24 = vld [vmem:[#allocation6 + $0x220] sm:$0xf0]  ;;  %v2417_v25 = vld [vmem:[#allocation6 + $0x210] sm:$0xf] }
  0x45   : > { %512 = vmatpush.bf16.msra.mxu0 %v2058_v27  ;;  %2585 = vmatpush.bf16.msra.mxu1 %v2058_v27  ;;  %v2993_v48 = vld [vmem:[%s2943_s19 + $0x10] sm:$0xff]  ;;  %v2525_v61 = vld [vmem:[#allocation6 + $0x1cc] sm:$0xf]  ;;  %s2751_s10 = scalar_lea.hbm %s3285_s3, 64 }
  0x46   : > { %2586 = vmatpush.bf16.msra.mxu2 %v2058_v27  ;;  %2587 = vmatpush.bf16.msra.mxu3 %v2058_v27  ;;  %v2083_v27 = vld [vmem:[#allocation6 + $0x3c] sm:$0xf0]  ;;  %v2528_v49 = vld [vmem:[#allocation6 + $0x1e4] sm:$0xf]  ;;  %v2395_v50 = vld [vmem:[#allocation6 + $0x1ec] sm:$0xf0]  ;;  %p2753_p12 = scmp.lt.s32.totalorder %s2751_s10, %s2747_s30 }
  0x47   : > { %v2086_v37 = vor.u32 %v2458_v26, %v2083_v27  ;;  %v2535_v26 = vld [vmem:[#allocation6 + $0x218] sm:$0xf0]  ;;  %v2498_v53 = vld [vmem:[#allocation6 + $0x130] sm:$0xf0] }
  0x48   : > { %513 = vmatmul.bf16.vlgmr.msra.gmra.mxu0 %v2954_v28  ;;  %523 = vmatmul.bf16.vlgmr.msra.gmra.mxu1 %v2957_v29  ;;  %v2986_v27 = vld [vmem:[%s2943_s19 + $0x8] sm:$0xff]  ;;  %p2754_p13 = por %p2753_p12, %p2752_p8 }
  0x49   : > { %554 = vmatpush.bf16.msrb.mxu1 %v2146_v33  ;;  %533 = vmatmul.bf16.vlgmr.msra.gmra.mxu2 %v2960_v40  ;;  %v2242_v33 = vor.u32 %v2493_v22, %v2239_v23  ;;  %v2425_v22 = vld [vmem:[#allocation6 + $0x218] sm:$0xf]  ;;  %v2422_v23 = vor.u32 %v2534_v12, %v2419_v13  ;;  %v2492_v13 = vld [vmem:[#allocation6 + $0x100] sm:$0xf0] }
  0x4a   : > { %1026 = vmatpush.bf16.msrb.mxu3 %v2286_v32  ;;  %603 = vmatpush.bf16.msrb.mxu2 %v2150_v42  ;;  %v2102_v32 = vor.u32 %v2463_v19, %v2101_v18  ;;  %v2213_v42 = vld [vmem:[#allocation6 + $0xd8] sm:$0xf]  ;;  %v2430_v19 = vor.u32 %v2538_v11, %v2429_v10  ;;  %v2371_v10 = vld [vmem:[#allocation6 + $0x1bc] sm:$0xf0]  ;;  %p2755_p0 = pnand %p2754_p13, %p2750_p4 }
  0x4b   : > { %543 = vmatmul.bf16.vlgmr.msra.gmra.mxu3 %v2963_v41  ;;  %1075 = vmatpush.bf16.msrb.mxu0 %v2290_v43  ;;  %v2488_v43 = vld [vmem:[#allocation6 + $0xe0] sm:$0xf0]  ;;  %v2233_v11 = vld [vmem:[#allocation6 + $0xf8] sm:$0xf] }
  0x4c   : > { %v2214_v51 = vor.u32 %v2488_v43, %v2213_v42  ;;  %v2413_v42 = vld [vmem:[#allocation6 + $0x200] sm:$0xf]  ;;  %v2533_v43 = vld [vmem:[#allocation6 + $0x208] sm:$0xf0] }
  0x4d   : > { %555 = vmatpush.bf16.msrb.mxu1 %v2134_v47  ;;  %v2230_v47 = vor.u32 %v2490_v38, %v2227_v39  ;;  %v2501_v39 = vld [vmem:[#allocation6 + $0x148] sm:$0xf0]  ;;  %v2414_v45 = vor.u32 %v2533_v43, %v2413_v42  ;;  %v2516_v42 = vld [vmem:[#allocation6 + $0x184] sm:$0xf]  ;;  %v2347_v43 = vld [vmem:[#allocation6 + $0x18c] sm:$0xf0] }
  0x4e   : > { %1027 = vmatpush.bf16.msrb.mxu3 %v2274_v46  ;;  %604 = vmatpush.bf16.msrb.mxu2 %v2138_v54  ;;  %v2090_v46 = vor.u32 %v2460_v35, %v2089_v34  ;;  %v2201_v54 = vld [vmem:[#allocation6 + $0xc0] sm:$0xf]  ;;  %v2418_v34 = vor.u32 %v2535_v26, %v2417_v25  ;;  %v2531_v35 = vld [vmem:[#allocation6 + $0x1fc] sm:$0xf] }
  0x4f   : > { %1076 = vmatpush.bf16.msrb.mxu0 %v2278_v55  ;;  %v2485_v55 = vld [vmem:[#allocation6 + $0xc8] sm:$0xf0]  ;;  %v2221_v26 = vld [vmem:[#allocation6 + $0xe0] sm:$0xf] }
  0x51   : > { %556 = vmatpush.bf16.msrb.mxu1 %v2122_v59  ;;  %v2431_v59 = vld [vmem:[#allocation6 + $0x234] sm:$0xf0] }
  0x52   : > { %1028 = vmatpush.bf16.msrb.mxu3 %v2262_v58  ;;  %605 = vmatpush.bf16.msrb.mxu2 %v2126_v2  ;;  %v2537_v58 = vld [vmem:[#allocation6 + $0x22c] sm:$0xf]  ;;  %v2202_v2 = vor.u32 %v2485_v55, %v2201_v54  ;;  %v2401_v54 = vld [vmem:[#allocation6 + $0x1e8] sm:$0xf]  ;;  %v2530_v55 = vld [vmem:[#allocation6 + $0x1f0] sm:$0xf0] }
  0x53   : > { %1077 = vmatpush.bf16.msrb.mxu0 %v2266_v3  ;;  %v2062_v3 = vor.u32 %v2452_v56, %v2059_v57  ;;  %v2402_v57 = vor.u32 %v2530_v55, %v2401_v54  ;;  %v3030_v54 = vld [vmem:[%s2943_s19 + $0x38] sm:$0xff] }
  0x55   : > { %557 = vmatpush.bf16.msrb.mxu1 %v2110_v7  ;;  %v2434_v7 = vor.u32 %v2537_v58, %v2431_v59  ;;  %v2393_v58 = vld [vmem:[#allocation6 + $0x1e0] sm:$0xf]  ;;  %v2529_v59 = vld [vmem:[#allocation6 + $0x1e8] sm:$0xf0] }
  0x56   : > { %1029 = vmatpush.bf16.msrb.mxu3 %v2250_v6  ;;  %606 = vmatpush.bf16.msrb.mxu2 %v2114_v14  ;;  %v2437_v6 = vld [vmem:[#allocation6 + $0x230] sm:$0xf]  ;;  %v2066_v14 = vor.u32 %v2454_v1, %v2065_v0  ;;  %v2394_v60 = vor.u32 %v2529_v59, %v2393_v58  ;;  %v2495_v1 = vld [vmem:[#allocation6 + $0x118] sm:$0xf0] }
  0x57   : > { %1078 = vmatpush.bf16.msrb.mxu0 %v2254_v15  ;;  %v2206_v15 = vor.u32 %v2484_v4, %v2203_v5  ;;  %v2438_v18 = vor.u32 %v2539_v9, %v2437_v6  ;;  %v2381_v6 = vld [vmem:[#allocation6 + $0x1c8] sm:$0xf]  ;;  %v2522_v9 = vld [vmem:[#allocation6 + $0x1b4] sm:$0xf] }
  0x58   : > { %518 = vmatmul.bf16.gmra.mxu0 %v2970_v16  ;;  %528 = vmatmul.bf16.gmra.mxu1 %v2973_v17  ;;  %v2374_v12 = vor.u32 %v2522_v9, %v2371_v10 }
  0x59   : > { %558 = vmatpush.bf16.msrb.mxu1 %v2098_v21  ;;  %538 = vmatmul.bf16.gmra.mxu2 %v2976_v30  ;;  %v2504_v21 = vld [vmem:[#allocation6 + $0x160] sm:$0xf0] }
  0x5a   : > { %1030 = vmatpush.bf16.msrb.mxu3 %v2238_v20  ;;  %607 = vmatpush.bf16.msrb.mxu2 %v2102_v32  ;;  %v2281_v20 = vld [vmem:[#allocation6 + $0x158] sm:$0xf] }
  0x5b   : > { %548 = vmatmul.bf16.gmra.mxu3 %v2979_v31  ;;  %1079 = vmatpush.bf16.msrb.mxu0 %v2242_v33  ;;  %v2282_v32 = vor.u32 %v2504_v21, %v2281_v20  ;;  %v2426_v33 = vor.u32 %v2536_v24, %v2425_v22  ;;  %v2369_v20 = vld [vmem:[#allocation6 + $0x1b0] sm:$0xf]  ;;  %v2523_v21 = vld [vmem:[#allocation6 + $0x1b8] sm:$0xf0]  ;;  %v2359_v24 = vld [vmem:[#allocation6 + $0x1a4] sm:$0xf0] }
  0x5c   : > { %v2370_v22 = vor.u32 %v2523_v21, %v2369_v20 }
  0x5d   : > { %559 = vmatpush.bf16.msrb.mxu1 %v2086_v37  ;;  %v2269_v37 = vld [vmem:[#allocation6 + $0x140] sm:$0xf] }
  0x5e   : > { %1031 = vmatpush.bf16.msrb.mxu3 %v2226_v36  ;;  %608 = vmatpush.bf16.msrb.mxu2 %v2090_v46  ;;  %v2407_v36 = vld [vmem:[#allocation6 + $0x204] sm:$0xf0]  ;;  %v2270_v44 = vor.u32 %v2501_v39, %v2269_v37  ;;  %v2405_v46 = vld [vmem:[#allocation6 + $0x1f8] sm:$0xf] }
  0x5f   : > { %1080 = vmatpush.bf16.msrb.mxu0 %v2230_v47  ;;  %v2410_v38 = vor.u32 %v2531_v35, %v2407_v36  ;;  %v2532_v47 = vld [vmem:[#allocation6 + $0x200] sm:$0xf0]  ;;  %v2521_v35 = vld [vmem:[#allocation6 + $0x1a8] sm:$0xf0]  ;;  %v2357_v37 = vld [vmem:[#allocation6 + $0x198] sm:$0xf] }
  0x61   : > { %560 = vmatpush.bf16.msrb.mxu1 %v2074_v52  ;;  %v2398_v52 = vor.u32 %v2528_v49, %v2395_v50  ;;  %v2518_v49 = vld [vmem:[#allocation6 + $0x190] sm:$0xf0] }
  0x62   : > { %1032 = vmatpush.bf16.msrb.mxu3 %v2214_v51  ;;  %609 = vmatpush.bf16.msrb.mxu2 %v2078_v62  ;;  %v2257_v51 = vld [vmem:[#allocation6 + $0x128] sm:$0xf]  ;;  %v2383_v62 = vld [vmem:[#allocation6 + $0x1d4] sm:$0xf0] }
  0x63   : > { %1081 = vmatpush.bf16.msrb.mxu0 %v2218_v63  ;;  %v2258_v56 = vor.u32 %v2498_v53, %v2257_v51  ;;  %v2245_v63 = vld [vmem:[#allocation6 + $0x110] sm:$0xf]  ;;  %v2386_v0 = vor.u32 %v2525_v61, %v2383_v62  ;;  %v2345_v51 = vld [vmem:[#allocation6 + $0x180] sm:$0xf] }
  0x64   : > { %v2246_v4 = vor.u32 %v2495_v1, %v2245_v63 }
  0x65   : > { %561 = vmatpush.bf16.msrb.mxu1 %v2062_v3  ;;  %v2527_v3 = vld [vmem:[#allocation6 + $0x1d8] sm:$0xf0] }
  0x66   : > { %1033 = vmatpush.bf16.msrb.mxu3 %v2202_v2  ;;  %610 = vmatpush.bf16.msrb.mxu2 %v2066_v14  ;;  %v2389_v2 = vld [vmem:[#allocation6 + $0x1d0] sm:$0xf]  ;;  %v2377_v14 = vld [vmem:[#allocation6 + $0x1b8] sm:$0xf] }
  0x67   : > { %1082 = vmatpush.bf16.msrb.mxu0 %v2206_v15  ;;  %v2390_v5 = vor.u32 %v2527_v3, %v2389_v2  ;;  %v2524_v15 = vld [vmem:[#allocation6 + $0x1c0] sm:$0xf0] }
  0x68   : > { %562 = vmatmul.bf16.vlgmr.msrb.gmra.mxu1 %v2954_v28 }
  0x69   : > { %1124 = vmatpush.bf16.msra.mxu1 %v2294_v8  ;;  %611 = vmatmul.bf16.vlgmr.msrb.gmra.mxu2 %v2954_v28  ;;  %v2406_v28 = vor.u32 %v2532_v47, %v2405_v46  ;;  %v2486_v46 = vld [vmem:[#allocation6 + $0xd0] sm:$0xf0]  ;;  %v2353_v47 = vld [vmem:[#allocation6 + $0x188] sm:$0xf] }
  0x6a   : > { %1592 = vmatpush.bf16.msra.mxu3 %v2434_v7  ;;  %1543 = vmatpush.bf16.msra.mxu2 %v2430_v19  ;;  %v2526_v7 = vld [vmem:[#allocation6 + $0x1d0] sm:$0xf0]  ;;  %v2378_v19 = vor.u32 %v2524_v15, %v2377_v14  ;;  %v2354_v50 = vor.u32 %v2518_v49, %v2353_v47 }
  0x6b   : > { %1641 = vmatpush.bf16.msra.mxu0 %v2438_v18  ;;  %1034 = vmatmul.bf16.vlgmr.msrb.gmra.mxu3 %v2986_v27  ;;  %v2382_v8 = vor.u32 %v2526_v7, %v2381_v6  ;;  %v2234_v18 = vor.u32 %v2492_v13, %v2233_v11  ;;  %v2508_v7 = vld [vmem:[%s2943_s19 + $0x10] sm:$0xff] }
  0x6c   : > { %1083 = vmatmul.bf16.vlgmr.msrb.gmra.mxu0 %v2986_v27 }
  0x6d   : > { %1125 = vmatpush.bf16.msra.mxu1 %v2282_v32  ;;  %v2489_v32 = vld [vmem:[#allocation6 + $0xe8] sm:$0xf0] }
  0x6e   : > { %1593 = vmatpush.bf16.msra.mxu3 %v2422_v23  ;;  %1544 = vmatpush.bf16.msra.mxu2 %v2418_v34  ;;  %v2519_v23 = vld [vmem:[#allocation6 + $0x19c] sm:$0xf]  ;;  %v2222_v34 = vor.u32 %v2489_v32, %v2221_v26 }
  0x6f   : > { %1642 = vmatpush.bf16.msra.mxu0 %v2426_v33  ;;  %v2362_v25 = vor.u32 %v2519_v23, %v2359_v24  ;;  %v2365_v33 = vld [vmem:[#allocation6 + $0x1a0] sm:$0xf] }
  0x70   : > { %v2366_v36 = vor.u32 %v2521_v35, %v2365_v33  ;;  %v2509_v33 = vld [vmem:[%s2943_s19 + $0x18] sm:$0xff] }
  0x71   : > { %1126 = vmatpush.bf16.msra.mxu1 %v2270_v44  ;;  %v2350_v44 = vor.u32 %v2516_v42, %v2347_v43 }
  0x72   : > { %1594 = vmatpush.bf16.msra.mxu3 %v2410_v38  ;;  %1545 = vmatpush.bf16.msra.mxu2 %v2406_v28  ;;  %v2520_v38 = vld [vmem:[#allocation6 + $0x1a0] sm:$0xf0] }
  0x73   : > { %1643 = vmatpush.bf16.msra.mxu0 %v2414_v45  ;;  %v2358_v39 = vor.u32 %v2520_v38, %v2357_v37  ;;  %v2209_v45 = vld [vmem:[#allocation6 + $0xc8] sm:$0xf] }
  0x74   : > { %v2210_v28 = vor.u32 %v2486_v46, %v2209_v45 }
  0x75   : > { %1127 = vmatpush.bf16.msra.mxu1 %v2258_v56 }
  0x76   : > { %1595 = vmatpush.bf16.msra.mxu3 %v2398_v52  ;;  %1546 = vmatpush.bf16.msra.mxu2 %v2394_v60  ;;  %v2517_v52 = vld [vmem:[#allocation6 + $0x188] sm:$0xf0] }
  0x77   : > { %1644 = vmatpush.bf16.msra.mxu0 %v2402_v57  ;;  %v2346_v55 = vor.u32 %v2517_v52, %v2345_v51 }
  0x78   : > { %567 = vmatmul.bf16.gmra.mxu1 %v2970_v16 }
  0x79   : > { %616 = vmatmul.bf16.gmra.mxu2 %v2970_v16  ;;  %v3000_v16 = vld [vmem:[%s2943_s19 + $0x18] sm:$0xff]  ;;  %1128 = vmatpush.bf16.msra.mxu1 %v2246_v4 }
  0x7a   : > { %1596 = vmatpush.bf16.msra.mxu3 %v2386_v0  ;;  %1547 = vmatpush.bf16.msra.mxu2 %v2382_v8  ;;  %v3043_v0 = vld [vmem:[%s2943_s19 + $0x40] sm:$0xff]  ;;  %v668_v8 = vlaneseq }
  0x7b   : > { %1039 = vmatmul.bf16.gmra.mxu3 %v2993_v48  ;;  %1645 = vmatpush.bf16.msra.mxu0 %v2390_v5 }
  0x7c   : > { %1088 = vmatmul.bf16.gmra.mxu0 %v2993_v48 }
  0x7d   : > { %1129 = vmatpush.bf16.msra.mxu1 %v2234_v18 }
  0x7e   : > { %1597 = vmatpush.bf16.msra.mxu3 %v2374_v12  ;;  %1548 = vmatpush.bf16.msra.mxu2 %v2370_v22 }
  0x7f   : > { %1646 = vmatpush.bf16.msra.mxu0 %v2378_v19 }
  0x81   : > { %1130 = vmatpush.bf16.msra.mxu1 %v2222_v34 }
  0x82   : > { %1598 = vmatpush.bf16.msra.mxu3 %v2362_v25  ;;  %1549 = vmatpush.bf16.msra.mxu2 %v2358_v39 }
  0x83   : > { %1647 = vmatpush.bf16.msra.mxu0 %v2366_v36 }
  0x85   : > { %1131 = vmatpush.bf16.msra.mxu1 %v2210_v28 }
  0x86   : > { %1599 = vmatpush.bf16.msra.mxu3 %v2350_v44  ;;  %1550 = vmatpush.bf16.msra.mxu2 %v2346_v55 }
  0x87   : > { %1648 = vmatpush.bf16.msra.mxu0 %v2354_v50 }
  0x88   : > { %572 = vmatmul.bf16.gmra.mxu1 %v2957_v29 }
  0x89   : > { %621 = vmatmul.bf16.gmra.mxu2 %v2957_v29  ;;  %v3007_v29 = vld [vmem:[%s2943_s19 + $0x20] sm:$0xff] }
  0x8b   : > { %1044 = vmatmul.bf16.gmra.mxu3 %v3000_v16 }
  0x8c   : > { %1093 = vmatmul.bf16.gmra.mxu0 %v3000_v16 }
  0x98   : > { %577 = vmatmul.bf16.gmra.mxu1 %v2973_v17 }
  0x99   : > { %626 = vmatmul.bf16.gmra.mxu2 %v2973_v17  ;;  %v3014_v17 = vld [vmem:[%s2943_s19 + $0x28] sm:$0xff] }
  0x9b   : > { %1049 = vmatmul.bf16.gmra.mxu3 %v3007_v29 }
  0x9c   : > { %1098 = vmatmul.bf16.gmra.mxu0 %v3007_v29 }
  0xa8   : > { %582 = vmatmul.bf16.gmra.mxu1 %v2960_v40 }
  0xa9   : > { %631 = vmatmul.bf16.gmra.mxu2 %v2960_v40  ;;  %v3021_v40 = vld [vmem:[%s2943_s19 + $0x30] sm:$0xff] }
  0xab   : > { %1054 = vmatmul.bf16.gmra.mxu3 %v3014_v17 }
  0xac   : > { %1103 = vmatmul.bf16.gmra.mxu0 %v3014_v17 }
  0xb8   : > { %587 = vmatmul.bf16.gmra.mxu1 %v2976_v30 }
  0xb9   : > { %636 = vmatmul.bf16.gmra.mxu2 %v2976_v30 }
  0xbb   : > { %1059 = vmatmul.bf16.gmra.mxu3 %v3021_v40 }
  0xbc   : > { %1108 = vmatmul.bf16.gmra.mxu0 %v3021_v40 }
  0xc5   : > { %v514_v30 = vpop.f32.mrf.mxu0  ;;  %v3027_v53 = vpop.f32.mrf.mxu1 }
  0xc8   : > { %592 = vmatmul.bf16.gmra.mxu1 %v2963_v41 }
  0xc9   : > { %641 = vmatmul.bf16.gmra.mxu2 %v2963_v41 }
  0xcb   : > { %1064 = vmatmul.bf16.gmra.mxu3 %v3030_v54 }
  0xcc   : > { %1113 = vmatmul.bf16.gmra.mxu0 %v3030_v54  ;;  %v3036_v56 = vpop.f32.mrf.mxu2 }
  0xcd   : > { %v516_v58 = vpop.f32.mrf.mxu0  ;;  %v526_v59 = vpop.f32.mrf.mxu1 }
  0xce   : > { %v3038_v57 = vpop.f32.mrf.mxu3  ;;  %v2510_v58 = vld [vmem:[%s2943_s19 + $0x20] sm:$0xff] }
  0xd4   : > { %v536_v60 = vpop.f32.mrf.mxu2 }
  0xd5   : > { %v519_v62 = vpop.f32.mrf.mxu0  ;;  %v3040_v63 = vpop.f32.mrf.mxu1 }
  0xd6   : > { %v546_v61 = vpop.f32.mrf.mxu3 }
  0xd8   : > { %597 = vmatmul.bf16.gmra.mxu1 %v2979_v31 }
  0xd9   : > { %646 = vmatmul.bf16.gmra.mxu2 %v2979_v31  ;;  %v3055_v31 = vshrl.u32 %v668_v8, 7 }
  0xdb   : > { %1069 = vmatmul.bf16.gmra.mxu3 %v3043_v0  ;;  %vm670_vm0 = vcmp.lt.s32.totalorder %v3055_v31, 7  ;;  %vm719_vm1 = vcmp.lt.s32.totalorder %v3055_v31, 6 }
  0xdc   : > { %1118 = vmatmul.bf16.gmra.mxu0 %v3043_v0  ;;  %v3049_v41 = vpop.f32.mrf.mxu2 }
  0xdd   : > { %v521_v2 = vpop.f32.mrf.mxu0  ;;  %v531_v3 = vpop.f32.mrf.mxu1 }
  0xde   : > { %v3051_v1 = vpop.f32.mrf.mxu3 }
  0xe4   : > { %v541_v4 = vpop.f32.mrf.mxu2 }
  0xe5   : > { %v563_v6 = vpop.f32.mrf.mxu1 }
  0xe6   : > { %v551_v5 = vpop.f32.mrf.mxu3  ;;  %v652_v13 = vrot.slane %v563_v6, 1 }
  0xe8   : > { %1132 = vmatmul.bf16.vlgmr.msra.gmra.mxu1 %v2986_v27 }
  0xe9   : > { %v1084_v9 = vpop.f32.mrf.mxu0  ;;  %1551 = vmatmul.bf16.vlgmr.msra.gmra.mxu2 %v2508_v7 }
  0xea   : > { %v1173_v14 = vrot.slane %v1084_v9, 1 }
  0xeb   : > { %1600 = vmatmul.bf16.vlgmr.msra.gmra.mxu3 %v2508_v7 }
  0xec   : > { %1649 = vmatmul.bf16.vlgmr.msra.gmra.mxu0 %v2508_v7  ;;  %v612_v10 = vpop.f32.mrf.mxu2 }
  0xed   : > { %v565_v12 = vpop.f32.mrf.mxu1  ;;  %v703_v22 = vrot.slane %v612_v10, 2 }
  0xee   : > { %v1035_v11 = vpop.f32.mrf.mxu3  ;;  %v653_v15 = vrot.slane %v565_v12, 1 }
  0xf0   : > { %v685_v19 = vsel %vm670_vm0, %v652_v13, %v653_v15 }
  0xf1   : > { %v1086_v18 = vpop.f32.mrf.mxu0  ;;  %v687_v27 = vadd.f32 %v685_v19, %v514_v30 }
  0xf2   : > { %v1174_v20 = vrot.slane %v1086_v18, 1  ;;  %v2511_v18 = vld [vmem:[%s2943_s19 + $0x28] sm:$0xff] }
  0xf4   : > { %v1203_v21 = vsel %vm670_vm0, %v1173_v14, %v1174_v20  ;;  %v614_v24 = vpop.f32.mrf.mxu2 }
  0xf5   : > { %v3062_v23 = vadd.f32 %v1203_v21, %v1035_v11  ;;  %v704_v26 = vrot.slane %v614_v24, 2  ;;  %v568_v32 = vpop.f32.mrf.mxu1 }
  0xf6   : > { %v1037_v25 = vpop.f32.mrf.mxu3  ;;  %v654_v42 = vrot.slane %v568_v32, 1 }
  0xf7   : > { %v734_v34 = vsel %vm719_vm1, %v703_v22, %v704_v26 }
  0xf8   : > { %v3068_v36 = vadd.f32 %v734_v34, %v687_v27  ;;  %1137 = vmatmul.bf16.gmra.mxu1 %v2993_v48 }
  0xf9   : > { %v1089_v35 = vpop.f32.mrf.mxu0  ;;  %1556 = vmatmul.bf16.gmra.mxu2 %v2509_v33 }
  0xfa   : > { %v1175_v43 = vrot.slane %v1089_v35, 1 }
  0xfb   : > { %1605 = vmatmul.bf16.gmra.mxu3 %v2509_v33 }
  0xfc   : > { %1654 = vmatmul.bf16.gmra.mxu0 %v2509_v33  ;;  %v617_v37 = vpop.f32.mrf.mxu2 }
  0xfd   : > { %v570_v39 = vpop.f32.mrf.mxu1  ;;  %v705_v48 = vrot.slane %v617_v37, 2 }
  0xfe   : > { %v1040_v38 = vpop.f32.mrf.mxu3  ;;  %v655_v44 = vrot.slane %v570_v39, 1 }
 0x100   : > { %v683_v46 = vsel %vm670_vm0, %v654_v42, %v655_v44 }
 0x101   : > { %v1091_v45 = vpop.f32.mrf.mxu0  ;;  %v689_v28 = vadd.f32 %v683_v46, %v519_v62 }
 0x102   : > { %v1176_v47 = vrot.slane %v1091_v45, 1  ;;  %v2512_v45 = vld [vmem:[%s2943_s19 + $0x30] sm:$0xff] }
 0x104   : > { %v1201_v49 = vsel %vm670_vm0, %v1175_v43, %v1176_v47  ;;  %v619_v51 = vpop.f32.mrf.mxu2 }
 0x105   : > { %v3075_v50 = vadd.f32 %v1201_v49, %v1040_v38  ;;  %v706_v30 = vrot.slane %v619_v51, 2  ;;  %v573_v55 = vpop.f32.mrf.mxu1 }
 0x106   : > { %v1042_v52 = vpop.f32.mrf.mxu3  ;;  %v656_v4 = vrot.slane %v573_v55, 1 }
 0x107   : > { %v732_v59 = vsel %vm719_vm1, %v705_v48, %v706_v30 }
 0x108   : > { %v3080_v61 = vadd.f32 %v732_v59, %v689_v28  ;;  %1142 = vmatmul.bf16.gmra.mxu1 %v3000_v16 }
 0x109   : > { %v1094_v60 = vpop.f32.mrf.mxu0  ;;  %1561 = vmatmul.bf16.gmra.mxu2 %v2510_v58 }
 0x10a   : > { %v1177_v5 = vrot.slane %v1094_v60, 1 }
 0x10b   : > { %1610 = vmatmul.bf16.gmra.mxu3 %v2510_v58 }
 0x10c   : > { %1659 = vmatmul.bf16.gmra.mxu0 %v2510_v58  ;;  %v622_v62 = vpop.f32.mrf.mxu2 }
 0x10d   : > { %v575_v3 = vpop.f32.mrf.mxu1  ;;  %v707_v11 = vrot.slane %v622_v62, 2 }
 0x10e   : > { %v1045_v2 = vpop.f32.mrf.mxu3  ;;  %v657_v6 = vrot.slane %v575_v3, 1 }
 0x110   : > { %v681_v8 = vsel %vm670_vm0, %v656_v4, %v657_v6 }
 0x111   : > { %v1096_v7 = vpop.f32.mrf.mxu0  ;;  %v691_v19 = vadd.f32 %v681_v8, %v3027_v53 }
 0x112   : > { %v1178_v9 = vrot.slane %v1096_v7, 1  ;;  %v2513_v7 = vld [vmem:[%s2943_s19 + $0x38] sm:$0xff] }
 0x114   : > { %v1199_v10 = vsel %vm670_vm0, %v1177_v5, %v1178_v9  ;;  %v624_v12 = vpop.f32.mrf.mxu2 }
 0x115   : > { %v3087_v16 = vadd.f32 %v1199_v10, %v1045_v2  ;;  %v708_v14 = vrot.slane %v624_v12, 2  ;;  %v578_v15 = vpop.f32.mrf.mxu1 }
 0x116   : > { %v1047_v13 = vpop.f32.mrf.mxu3  ;;  %v658_v26 = vrot.slane %v578_v15, 1 }
 0x117   : > { %v730_v20 = vsel %vm719_vm1, %v707_v11, %v708_v14 }
 0x118   : > { %v3093_v21 = vadd.f32 %v730_v20, %v691_v19  ;;  %1147 = vmatmul.bf16.gmra.mxu1 %v3007_v29 }
 0x119   : > { %v1099_v27 = vpop.f32.mrf.mxu0  ;;  %1566 = vmatmul.bf16.gmra.mxu2 %v2511_v18 }
 0x11a   : > { %v1179_v32 = vrot.slane %v1099_v27, 1 }
 0x11b   : > { %1615 = vmatmul.bf16.gmra.mxu3 %v2511_v18 }
 0x11c   : > { %1664 = vmatmul.bf16.gmra.mxu0 %v2511_v18  ;;  %v627_v22 = vpop.f32.mrf.mxu2 }
 0x11d   : > { %v580_v25 = vpop.f32.mrf.mxu1  ;;  %v709_v38 = vrot.slane %v627_v22, 2 }
 0x11e   : > { %v1050_v24 = vpop.f32.mrf.mxu3  ;;  %v659_v33 = vrot.slane %v580_v25, 1 }
 0x120   : > { %v679_v53 = vsel %vm670_vm0, %v658_v26, %v659_v33 }
 0x121   : > { %v1101_v34 = vpop.f32.mrf.mxu0  ;;  %v693_v46 = vadd.f32 %v679_v53, %v3040_v63 }
 0x122   : > { %v1180_v35 = vrot.slane %v1101_v34, 1  ;;  %v2514_v34 = vld [vmem:[%s2943_s19 + $0x40] sm:$0xff] }
 0x124   : > { %v1197_v37 = vsel %vm670_vm0, %v1179_v32, %v1180_v35  ;;  %v629_v39 = vpop.f32.mrf.mxu2 }
 0x125   : > { %v3100_v29 = vadd.f32 %v1197_v37, %v1050_v24  ;;  %v710_v43 = vrot.slane %v629_v39, 2  ;;  %v583_v44 = vpop.f32.mrf.mxu1 }
 0x126   : > { %v1052_v42 = vpop.f32.mrf.mxu3  ;;  %v660_v30 = vrot.slane %v583_v44, 1 }
 0x127   : > { %v728_v47 = vsel %vm719_vm1, %v709_v38, %v710_v43 }
 0x128   : > { %v3106_v49 = vadd.f32 %v728_v47, %v693_v46  ;;  %1152 = vmatmul.bf16.gmra.mxu1 %v3014_v17 }
 0x129   : > { %v1104_v28 = vpop.f32.mrf.mxu0  ;;  %1571 = vmatmul.bf16.gmra.mxu2 %v2512_v45 }
 0x12a   : > { %v1181_v55 = vrot.slane %v1104_v28, 1 }
 0x12b   : > { %1620 = vmatmul.bf16.gmra.mxu3 %v2512_v45 }
 0x12c   : > { %1669 = vmatmul.bf16.gmra.mxu0 %v2512_v45  ;;  %v632_v48 = vpop.f32.mrf.mxu2 }
 0x12d   : > { %v585_v52 = vpop.f32.mrf.mxu1  ;;  %v711_v2 = vrot.slane %v632_v48, 2 }
 0x12e   : > { %v1055_v51 = vpop.f32.mrf.mxu3  ;;  %v661_v58 = vrot.slane %v585_v52, 1 }
 0x130   : > { %v677_v63 = vsel %vm670_vm0, %v660_v30, %v661_v58 }
 0x131   : > { %v1106_v59 = vpop.f32.mrf.mxu0  ;;  %v695_v8 = vadd.f32 %v677_v63, %v3036_v56 }
 0x132   : > { %v1182_v60 = vrot.slane %v1106_v59, 1  ;;  %v2515_v59 = vld [vmem:[%s2943_s19 + $0x48] sm:$0xff] }
 0x134   : > { %v1195_v62 = vsel %vm670_vm0, %v1181_v55, %v1182_v60  ;;  %v634_v3 = vpop.f32.mrf.mxu2 }
 0x135   : > { %v3113_v17 = vadd.f32 %v1195_v62, %v1055_v51  ;;  %v712_v5 = vrot.slane %v634_v3, 2  ;;  %v588_v6 = vpop.f32.mrf.mxu1 }
 0x136   : > { %v1057_v4 = vpop.f32.mrf.mxu3  ;;  %v662_v15 = vrot.slane %v588_v6, 1 }
 0x137   : > { %v726_v9 = vsel %vm719_vm1, %v711_v2, %v712_v5 }
 0x138   : > { %v3119_v11 = vadd.f32 %v726_v9, %v695_v8  ;;  %1157 = vmatmul.bf16.gmra.mxu1 %v3021_v40 }
 0x139   : > { %v1109_v10 = vpop.f32.mrf.mxu0  ;;  %1576 = vmatmul.bf16.gmra.mxu2 %v2513_v7 }
 0x13a   : > { %v1183_v18 = vrot.slane %v1109_v10, 1 }
 0x13b   : > { %1625 = vmatmul.bf16.gmra.mxu3 %v2513_v7 }
 0x13c   : > { %1674 = vmatmul.bf16.gmra.mxu0 %v2513_v7  ;;  %v637_v12 = vpop.f32.mrf.mxu2 }
 0x13d   : > { %v590_v14 = vpop.f32.mrf.mxu1  ;;  %v713_v24 = vrot.slane %v637_v12, 2 }
 0x13e   : > { %v1060_v13 = vpop.f32.mrf.mxu3  ;;  %v663_v19 = vrot.slane %v590_v14, 1 }
 0x140   : > { %v675_v56 = vsel %vm670_vm0, %v662_v15, %v663_v19 }
 0x141   : > { %v1111_v20 = vpop.f32.mrf.mxu0  ;;  %v697_v53 = vadd.f32 %v675_v56, %v3049_v41 }
 0x142   : > { %v1184_v27 = vrot.slane %v1111_v20, 1 }
 0x144   : > { %v1193_v22 = vsel %vm670_vm0, %v1183_v18, %v1184_v27  ;;  %v639_v25 = vpop.f32.mrf.mxu2 }
 0x145   : > { %v3126_v40 = vadd.f32 %v1193_v22, %v1060_v13  ;;  %v714_v32 = vrot.slane %v639_v25, 2  ;;  %v593_v33 = vpop.f32.mrf.mxu1 }
 0x146   : > { %v1062_v26 = vpop.f32.mrf.mxu3  ;;  %v664_v44 = vrot.slane %v593_v33, 1 }
 0x147   : > { %v724_v35 = vsel %vm719_vm1, %v713_v24, %v714_v32 }
 0x148   : > { %v3132_v38 = vadd.f32 %v724_v35, %v697_v53  ;;  %1162 = vmatmul.bf16.gmra.mxu1 %v3030_v54 }
 0x149   : > { %v1114_v37 = vpop.f32.mrf.mxu0  ;;  %1581 = vmatmul.bf16.gmra.mxu2 %v2514_v34 }
 0x14a   : > { %v1185_v45 = vrot.slane %v1114_v37, 1 }
 0x14b   : > { %1630 = vmatmul.bf16.gmra.mxu3 %v2514_v34 }
 0x14c   : > { %1679 = vmatmul.bf16.gmra.mxu0 %v2514_v34  ;;  %v642_v39 = vpop.f32.mrf.mxu2 }
 0x14d   : > { %v595_v43 = vpop.f32.mrf.mxu1  ;;  %v715_v51 = vrot.slane %v642_v39, 2 }
 0x14e   : > { %v1065_v42 = vpop.f32.mrf.mxu3  ;;  %v665_v46 = vrot.slane %v595_v43, 1 }
 0x150   : > { %v673_v41 = vsel %vm670_vm0, %v664_v44, %v665_v46 }
 0x151   : > { %v1116_v47 = vpop.f32.mrf.mxu0  ;;  %v699_v63 = vadd.f32 %v673_v41, %v3038_v57 }
 0x152   : > { %v1186_v28 = vrot.slane %v1116_v47, 1 }
 0x154   : > { %v1191_v48 = vsel %vm670_vm0, %v1185_v45, %v1186_v28  ;;  %v644_v52 = vpop.f32.mrf.mxu2 }
 0x155   : > { %v3139_v54 = vadd.f32 %v1191_v48, %v1065_v42  ;;  %v716_v55 = vrot.slane %v644_v52, 2  ;;  %v598_v58 = vpop.f32.mrf.mxu1 }
 0x156   : > { %v1067_v30 = vpop.f32.mrf.mxu3  ;;  %v666_v6 = vrot.slane %v598_v58, 1 }
 0x157   : > { %v722_v60 = vsel %vm719_vm1, %v715_v51, %v716_v55 }
 0x158   : > { %v3145_v2 = vadd.f32 %v722_v60, %v699_v63  ;;  %1167 = vmatmul.bf16.gmra.mxu1 %v3043_v0 }
 0x159   : > { %v1119_v62 = vpop.f32.mrf.mxu0  ;;  %1586 = vmatmul.bf16.gmra.mxu2 %v2515_v59 }
 0x15a   : > { %v1187_v7 = vrot.slane %v1119_v62, 1 }
 0x15b   : > { %1635 = vmatmul.bf16.gmra.mxu3 %v2515_v59 }
 0x15c   : > { %1684 = vmatmul.bf16.gmra.mxu0 %v2515_v59  ;;  %v647_v3 = vpop.f32.mrf.mxu2 }
 0x15d   : > { %v600_v5 = vpop.f32.mrf.mxu1  ;;  %v717_v13 = vrot.slane %v647_v3, 2 }
 0x15e   : > { %v1070_v4 = vpop.f32.mrf.mxu3  ;;  %v667_v8 = vrot.slane %v600_v5, 1 }
 0x160   : > { %v671_v57 = vsel %vm670_vm0, %v666_v6, %v667_v8 }
 0x161   : > { %v1121_v9 = vpop.f32.mrf.mxu0  ;;  %v701_v20 = vadd.f32 %v671_v57, %v3051_v1 }
 0x162   : > { %v1188_v10 = vrot.slane %v1121_v9, 1 }
 0x164   : > { %v1189_v12 = vsel %vm670_vm0, %v1187_v7, %v1188_v10  ;;  %v649_v0 = vpop.f32.mrf.mxu2 }
 0x165   : > { %v3152_v14 = vadd.f32 %v1189_v12, %v1070_v4  ;;  %v718_v18 = vrot.slane %v649_v0, 2  ;;  %v1133_v19 = vpop.f32.mrf.mxu1 }
 0x166   : > { %v1072_v15 = vpop.f32.mrf.mxu3  ;;  %v1221_v32 = vrot.slane %v1133_v19, 2 }
 0x167   : > { %v720_v56 = vsel %vm719_vm1, %v717_v13, %v718_v18 }
 0x168   : > { %v3157_v22 = vadd.f32 %v720_v56, %v701_v20 }
 0x169   : > { %v1650_v27 = vpop.f32.mrf.mxu0 }
 0x16a   : > { %v1738_v52 = vrot.slane %v1650_v27, 2 }
 0x16c   : > { %v1552_v25 = vpop.f32.mrf.mxu2 }
 0x16d   : > { %v1135_v26 = vpop.f32.mrf.mxu1 }
 0x16e   : > { %v1601_v24 = vpop.f32.mrf.mxu3  ;;  %v1222_v33 = vrot.slane %v1135_v26, 2 }
 0x16f   : > { %v1690_v45 = vrot.slane %v1601_v24, 1 }
 0x170   : > { %v1251_v53 = vsel %vm719_vm1, %v1221_v32, %v1222_v33 }
 0x171   : > { %v1652_v34 = vpop.f32.mrf.mxu0  ;;  %v1253_v35 = vadd.f32 %v1251_v53, %v3062_v23 }
 0x172   : > { %v1739_v30 = vrot.slane %v1652_v34, 2 }
 0x173   : > { %v1285_v37 = vadd.f32 %v1253_v35, %v3068_v36 }
 0x174   : > { %v1554_v39 = vpop.f32.mrf.mxu2  ;;  %v1768_v59 = vsel %vm719_vm1, %v1738_v52, %v1739_v30 }
 0x175   : > { %v1138_v42 = vpop.f32.mrf.mxu1 }
 0x176   : > { %v1603_v1 = vpop.f32.mrf.mxu3  ;;  %v1223_v48 = vrot.slane %v1138_v42, 2 }
 0x177   : > { %v1691_v44 = vrot.slane %v1603_v1, 1 }
 0x179   : > { %v1655_v43 = vpop.f32.mrf.mxu0  ;;  %v1720_v41 = vsel %vm670_vm0, %v1690_v45, %v1691_v44 }
 0x17a   : > { %v1722_v23 = vadd.f32 %v1720_v41, %v1552_v25  ;;  %v1740_v4 = vrot.slane %v1655_v43, 2 }
 0x17c   : > { %v1557_v47 = vpop.f32.mrf.mxu2  ;;  %v1770_v60 = vadd.f32 %v1768_v59, %v1722_v23 }
 0x17d   : > { %v1140_v28 = vpop.f32.mrf.mxu1 }
 0x17e   : > { %v1606_v46 = vpop.f32.mrf.mxu3  ;;  %v1224_v51 = vrot.slane %v1140_v28, 2  ;;  %v1802_v10 = vadd.f32 %v1770_v60, %v1285_v37 }
 0x17f   : > { %v1692_v5 = vrot.slane %v1606_v46, 1 }
 0x180   : > { %v1249_v36 = vsel %vm719_vm1, %v1223_v48, %v1224_v51 }
 0x181   : > { %v1657_v55 = vpop.f32.mrf.mxu0  ;;  %v1255_v58 = vadd.f32 %v1249_v36, %v3075_v50  ;;  %v3176_v50 = vld [vmem:[%s3284_s2] ss:$0 sm:$0xff] }
 0x182   : > { %v1741_v6 = vrot.slane %v1657_v55, 2  ;;  %v1849_v0 = vadd.f32 %v3176_v50, %v1802_v10 }
 0x183   : > { %v1287_v63 = vadd.f32 %v1255_v58, %v3080_v61 }
 0x184   : > { %v1559_v3 = vpop.f32.mrf.mxu2  ;;  %v1766_v12 = vsel %vm719_vm1, %v1740_v4, %v1741_v6  ;;  %v1857_v26 = vmax.f32 %v1849_v0, 0.0 }
 0x185   : > { %v1143_v8 = vpop.f32.mrf.mxu1 }
 0x186   : > { %v1608_v62 = vpop.f32.mrf.mxu3  ;;  %v1225_v27 = vrot.slane %v1143_v8, 2 }
 0x187   : > { %v1693_v7 = vrot.slane %v1608_v62, 1 }
 0x189   : > { %v1718_v9 = vsel %vm670_vm0, %v1692_v5, %v1693_v7  ;;  %v1660_v57 = vpop.f32.mrf.mxu0 }
 0x18a   : > { %v1724_v61 = vadd.f32 %v1718_v9, %v1557_v47  ;;  %v1742_v48 = vrot.slane %v1660_v57, 2 }
 0x18c   : > { %v1772_v13 = vadd.f32 %v1766_v12, %v1724_v61  ;;  %v1562_v19 = vpop.f32.mrf.mxu2 }
 0x18d   : > { %v1145_v20 = vpop.f32.mrf.mxu1 }
 0x18e   : > { %v1804_v15 = vadd.f32 %v1772_v13, %v1287_v63  ;;  %v1611_v18 = vpop.f32.mrf.mxu3  ;;  %v1226_v24 = vrot.slane %v1145_v20, 2 }
 0x18f   : > { %v1694_v44 = vrot.slane %v1611_v18, 1 }
 0x190   : > { %v1850_v56 = vadd.f32 %v3176_v50, %v1804_v15  ;;  %v1247_v33 = vsel %vm719_vm1, %v1225_v27, %v1226_v24 }
 0x191   : > { %v1662_v25 = vpop.f32.mrf.mxu0  ;;  %v1257_v34 = vadd.f32 %v1247_v33, %v3087_v16 }
 0x192   : > { %v1858_v32 = vmax.f32 %v1850_v56, 0.0 }
 0x193   : > { %v1289_v35 = vadd.f32 %v1257_v34, %v3093_v21  ;;  %v1743_v21 = vrot.slane %v1662_v25, 2 }
 0x194   : > { %v2544_v53 = vpack.c.bf16 %v1858_v32, %v1857_v26  ;;  %v1564_v1 = vpop.f32.mrf.mxu2 }
 0x195   : > { %v1148_v39 = vpop.f32.mrf.mxu1  ;;  %v1764_v23 = vsel %vm719_vm1, %v1742_v48, %v1743_v21 }
 0x196   : > { %2545 = vst [vmem:[%s3187_s9] sm:$0xff] %v2544_v53   ;;  %v1613_v37 = vpop.f32.mrf.mxu3  ;;  %v1227_v16 = vrot.slane %v1148_v39, 2 }
 0x197   : > { %v1695_v43 = vrot.slane %v1613_v37, 1 }
 0x199   : > { %v1665_v42 = vpop.f32.mrf.mxu0  ;;  %v1716_v47 = vsel %vm670_vm0, %v1694_v44, %v1695_v43 }
 0x19a   : > { %v1726_v52 = vadd.f32 %v1716_v47, %v1562_v19  ;;  %v1744_v60 = vrot.slane %v1665_v42, 2 }
 0x19c   : > { %v1567_v46 = vpop.f32.mrf.mxu2  ;;  %v1774_v58 = vadd.f32 %v1764_v23, %v1726_v52 }
 0x19d   : > { %v1150_v41 = vpop.f32.mrf.mxu1 }
 0x19e   : > { %v1616_v45 = vpop.f32.mrf.mxu3  ;;  %v1228_v28 = vrot.slane %v1150_v41, 2  ;;  %v1806_v8 = vadd.f32 %v1774_v58, %v1289_v35 }
 0x19f   : > { %v1696_v62 = vrot.slane %v1616_v45, 1 }
 0x1a0   : > { %v1245_v30 = vsel %vm719_vm1, %v1227_v16, %v1228_v28 }
 0x1a1   : > { %v1667_v51 = vpop.f32.mrf.mxu0  ;;  %v1259_v55 = vadd.f32 %v1245_v30, %v3100_v29 }
 0x1a2   : > { %v1745_v3 = vrot.slane %v1667_v51, 2 }
 0x1a3   : > { %v1291_v36 = vadd.f32 %v1259_v55, %v3106_v49  ;;  %v1851_v49 = vadd.f32 %v3176_v50, %v1806_v8 }
 0x1a4   : > { %v1569_v63 = vpop.f32.mrf.mxu2  ;;  %v1762_v29 = vsel %vm719_vm1, %v1744_v60, %v1745_v3 }
 0x1a5   : > { %v1153_v5 = vpop.f32.mrf.mxu1  ;;  %v1859_v20 = vmax.f32 %v1851_v49, 0.0 }
 0x1a6   : > { %v1618_v59 = vpop.f32.mrf.mxu3  ;;  %v1229_v15 = vrot.slane %v1153_v5, 2 }
 0x1a7   : > { %v1697_v4 = vrot.slane %v1618_v59, 1 }
 0x1a9   : > { %v1714_v6 = vsel %vm670_vm0, %v1696_v62, %v1697_v4  ;;  %v1670_v7 = vpop.f32.mrf.mxu0 }
 0x1aa   : > { %v1728_v9 = vadd.f32 %v1714_v6, %v1567_v46  ;;  %v1746_v46 = vrot.slane %v1670_v7, 2 }
 0x1ac   : > { %v1776_v57 = vadd.f32 %v1762_v29, %v1728_v9  ;;  %v1572_v12 = vpop.f32.mrf.mxu2 }
 0x1ad   : > { %v1155_v13 = vpop.f32.mrf.mxu1 }
 0x1ae   : > { %v1808_v10 = vadd.f32 %v1776_v57, %v1291_v36  ;;  %v1621_v61 = vpop.f32.mrf.mxu3  ;;  %v1230_v18 = vrot.slane %v1155_v13, 2 }
 0x1af   : > { %v1698_v37 = vrot.slane %v1621_v61, 1 }
 0x1b0   : > { %v1852_v0 = vadd.f32 %v3176_v50, %v1808_v10  ;;  %v1243_v27 = vsel %vm719_vm1, %v1229_v15, %v1230_v18 }
 0x1b1   : > { %v1672_v19 = vpop.f32.mrf.mxu0  ;;  %v1261_v24 = vadd.f32 %v1243_v27, %v3113_v17 }
 0x1b2   : > { %v1860_v56 = vmax.f32 %v1852_v0, 0.0  ;;  %v1747_v17 = vrot.slane %v1672_v19, 2 }
 0x1b3   : > { %v1293_v26 = vadd.f32 %v1261_v24, %v3119_v11 }
 0x1b4   : > { %v2549_v25 = vpack.c.bf16 %v1860_v56, %v1859_v20  ;;  %v1574_v33 = vpop.f32.mrf.mxu2  ;;  %v1760_v28 = vsel %vm719_vm1, %v1746_v46, %v1747_v17 }
 0x1b5   : > { %v1158_v34 = vpop.f32.mrf.mxu1 }
 0x1b6   : > { %2561 = vst [vmem:[%s3187_s9 + $0x8] sm:$0xff] %v2549_v25   ;;  %v1623_v32 = vpop.f32.mrf.mxu3  ;;  %v1231_v44 = vrot.slane %v1158_v34, 2 }
 0x1b7   : > { %v1699_v35 = vrot.slane %v1623_v32, 1 }
 0x1b9   : > { %v1675_v53 = vpop.f32.mrf.mxu0  ;;  %v1712_v42 = vsel %vm670_vm0, %v1698_v37, %v1699_v35 }
 0x1ba   : > { %v1730_v41 = vadd.f32 %v1712_v42, %v1572_v12  ;;  %v1748_v30 = vrot.slane %v1675_v53, 2 }
 0x1bc   : > { %v1577_v39 = vpop.f32.mrf.mxu2  ;;  %v1778_v21 = vadd.f32 %v1760_v28, %v1730_v41 }
 0x1bd   : > { %v1160_v43 = vpop.f32.mrf.mxu1 }
 0x1be   : > { %v1626_v1 = vpop.f32.mrf.mxu3  ;;  %v1232_v45 = vrot.slane %v1160_v43, 2  ;;  %v1810_v60 = vadd.f32 %v1778_v21, %v1293_v26 }
 0x1bf   : > { %v1700_v55 = vrot.slane %v1626_v1, 1 }
 0x1c0   : > { %v1241_v11 = vsel %vm719_vm1, %v1231_v44, %v1232_v45 }
 0x1c1   : > { %v1677_v47 = vpop.f32.mrf.mxu0  ;;  %v1263_v16 = vadd.f32 %v1241_v11, %v3126_v40 }
 0x1c2   : > { %v1749_v23 = vrot.slane %v1677_v47, 2 }
 0x1c3   : > { %v1295_v48 = vadd.f32 %v1263_v16, %v3132_v38  ;;  %v1853_v38 = vadd.f32 %v3176_v50, %v1810_v60 }
 0x1c4   : > { %v1579_v52 = vpop.f32.mrf.mxu2  ;;  %v1758_v40 = vsel %vm719_vm1, %v1748_v30, %v1749_v23 }
 0x1c5   : > { %v1163_v58 = vpop.f32.mrf.mxu1  ;;  %v1861_v49 = vmax.f32 %v1853_v38, 0.0 }
 0x1c6   : > { %v1628_v51 = vpop.f32.mrf.mxu3  ;;  %v1233_v9 = vrot.slane %v1163_v58, 2 }
 0x1c7   : > { %v1701_v36 = vrot.slane %v1628_v51, 1 }
 0x1c9   : > { %v1710_v59 = vsel %vm670_vm0, %v1700_v55, %v1701_v36  ;;  %v1680_v63 = vpop.f32.mrf.mxu0 }
 0x1ca   : > { %v1732_v62 = vadd.f32 %v1710_v59, %v1577_v39  ;;  %v1750_v53 = vrot.slane %v1680_v63, 2 }
 0x1cc   : > { %v1780_v3 = vadd.f32 %v1758_v40, %v1732_v62  ;;  %v1582_v6 = vpop.f32.mrf.mxu2 }
 0x1cd   : > { %v1165_v7 = vpop.f32.mrf.mxu1 }
 0x1ce   : > { %v1812_v4 = vadd.f32 %v1780_v3, %v1295_v48  ;;  %v1631_v5 = vpop.f32.mrf.mxu3  ;;  %v1234_v29 = vrot.slane %v1165_v7, 2 }
 0x1cf   : > { %v1702_v27 = vrot.slane %v1631_v5, 1 }
 0x1d0   : > { %v1854_v8 = vadd.f32 %v3176_v50, %v1812_v4  ;;  %v1239_v61 = vsel %vm719_vm1, %v1233_v9, %v1234_v29 }
 0x1d1   : > { %v1682_v57 = vpop.f32.mrf.mxu0  ;;  %v1265_v12 = vadd.f32 %v1239_v61, %v3139_v54 }
 0x1d2   : > { %v1862_v10 = vmax.f32 %v1854_v8, 0.0  ;;  %v1751_v54 = vrot.slane %v1682_v57, 2 }
 0x1d3   : > { %v1297_v0 = vadd.f32 %v1265_v12, %v3145_v2 }
 0x1d4   : > { %v2554_v13 = vpack.c.bf16 %v1862_v10, %v1861_v49  ;;  %v1584_v18 = vpop.f32.mrf.mxu2  ;;  %v1756_v39 = vsel %vm719_vm1, %v1750_v53, %v1751_v54 }
 0x1d5   : > { %v1168_v19 = vpop.f32.mrf.mxu1 }
 0x1d6   : > { %2562 = vst [vmem:[%s3187_s9 + $0x10] sm:$0xff] %v2554_v13   ;;  %v1633_v15 = vpop.f32.mrf.mxu3  ;;  %v1235_v33 = vrot.slane %v1168_v19, 2 }
 0x1d7   : > { %v1703_v56 = vrot.slane %v1633_v15, 1 }
 0x1d9   : > { %v1685_v20 = vpop.f32.mrf.mxu0  ;;  %v1708_v26 = vsel %vm670_vm0, %v1702_v27, %v1703_v56 }
 0x1da   : > { %v1734_v35 = vadd.f32 %v1708_v26, %v1582_v6  ;;  %v1752_v46 = vrot.slane %v1685_v20, 2 }
 0x1dc   : > { %v1587_v25 = vpop.f32.mrf.mxu2  ;;  %v1782_v43 = vadd.f32 %v1756_v39, %v1734_v35 }
 0x1dd   : > { %v1170_v32 = vpop.f32.mrf.mxu1 }
 0x1de   : > { %v1636_v24 = vpop.f32.mrf.mxu3  ;;  %v1236_v34 = vrot.slane %v1170_v32, 2  ;;  %v1814_v16 = vadd.f32 %v1782_v43, %v1297_v0 }
 0x1df   : > { %v1704_v17 = vrot.slane %v1636_v24, 1 }
 0x1e0   : > { %v1237_v2 = vsel %vm719_vm1, %v1235_v33, %v1236_v34  ;;  %v1855_v48 = vadd.f32 %v3176_v50, %v1814_v16 }
 0x1e1   : > { %v1267_v37 = vadd.f32 %v1237_v2, %v3152_v14  ;;  %v1687_v1 = vpop.f32.mrf.mxu0 }
 0x1e2   : > { %v1753_v47 = vrot.slane %v1687_v1, 2  ;;  %v1863_v52 = vmax.f32 %v1855_v48, 0.0 }
 0x1e3   : > { %v1299_v42 = vadd.f32 %v1267_v37, %v3157_v22 }
 0x1e4   : > { %v1589_v45 = vpop.f32.mrf.mxu2  ;;  %v1754_v28 = vsel %vm719_vm1, %v1752_v46, %v1753_v47 }
 0x1e6   : > { %v1638_v44 = vpop.f32.mrf.mxu3 }
 0x1e7   : > { %v1705_v41 = vrot.slane %v1638_v44, 1 }
 0x1e9   : > { %v1706_v11 = vsel %vm670_vm0, %v1704_v17, %v1705_v41 }
 0x1ea   : > { %v1736_v14 = vadd.f32 %v1706_v11, %v1587_v25 }
 0x1ec   : > { %v1784_v22 = vadd.f32 %v1754_v28, %v1736_v14 }
 0x1ee   : > { %v1816_v21 = vadd.f32 %v1784_v22, %v1299_v42 }
 0x1f0   : > { %v1856_v51 = vadd.f32 %v3176_v50, %v1816_v21 }
 0x1f2   : > { %v1864_v30 = vmax.f32 %v1856_v51, 0.0 }
 0x1f4   : > { %v2559_v55 = vpack.c.bf16 %v1864_v30, %v1863_v52 }
 0x1f6   : > { %2563 = vst [vmem:[%s3187_s9 + $0x18] sm:$0xff] %v2559_v55  }
 0x1f7   : > { %2758 = shalt.err (!%p2755_p0)
}
 0x1f8   : > { %s2824_s6 = smov 64   ;;  %s2825_s22 = smov 4  }
 0x1f9   : > { %2597 = dma.vmem_to_hbm [thread:$0]  (%p2921_p5), %s1896_s28, 512, %s1898_s21, %s1882_s15, %s2824_s6, %s2824_s6, %s2825_s22  }
 0x1fa PF: > { %s1912_s27 = sand.u32 1, %s2797_s12   ;;  %p2608_p3 = pnand %p2018_p11, %p2895_p6 }
 0x1fb   : > { %s1913_s9 = scalar_lea.sflag [#allocation5], %s1912_s27 }
 0x1fc   : > { %p2609_p7 = pneg %p2608_p3 }
 0x1fe   : > { %2792 = dma.done.wait (%p2609_p7), %s1913_s9, 512  }
 0x1ff   : > { %2794 = vsyncadd (%p2609_p7), %s1913_s9, 4294966784  ;;  %s20_s17 = sadd.s32 1, %s2817_s17   ;;  %s3292_s12 = smov %s2801_s13 }
 0x200   : > { %p17_p9 = scmp.ge.s32.totalorder %s20_s17, 4   ;;  %s3293_s13 = smov %s2805_s14 }
 0x201   : > { %s3294_s14 = smov %s2930_s11  ;;  %s3295_s15 = smov %s2813_s16 }
 0x202   : > { %s3296_s16 = smov %s3298_s5  ;;  %19 = sbr.rel (!%p17_p9) target bundleno = 7 (0x7), region = 97 }
 0x207   :  { %1919 = vsyncpa [#allocation4], 1 }
 0x208   :  { %1921 = vsyncpa [#allocation4 + $0x1], 1 }
 0x209   :  { %1922 = vsyncpa [#allocation7], 1 }
 0x20a   :  { %1923 = vsyncpa [#allocation5], 1 }
 0x20b   :  { %1925 = vsyncpa [#allocation5 + $0x1], 1 }

</bundles_post_ra>
